<compile_context>
chip_gen: v7x
topology: tpu7x:2x2x1
jax: 0.10.0
libtpu: 0.0.40
codegen_flags: <defaults>
</compile_context>

<pallas_src>
import functools

import jax
import jax.numpy as jnp
from jax.experimental import pallas as pl
from jax.experimental.pallas import tpu as pltpu

MAX_SPAN = 255
K_REL = MAX_SPAN - 1            # table row of relative distance 0
R_TAB = 2 * MAX_SPAN - 1        # 509 rows in the raw RPE embedding tables
BN_EPS = 1e-5
BN_SCALE = 1.0 / (1.0 + BN_EPS) ** 0.5  # eval-mode BatchNorm1d, default params


def _round_up(x, m):
    return ((x + m - 1) // m) * m


# ------------------------------ in-kernel skews -------------------------------
# Software "strided roll": compose ceil(log2(L)) static lane/sublane rotations,
# selecting per-row / per-column with jnp.where.  Rolls go to the XLU slot,
# selects to the VPU slot; no (L, M, depth) gather tensor is ever built.
# The per-bit masks are hoisted by the caller and shared across skews / heads.

def _skew_rows(p, sign, masks, r_pad):
    """out[r, j] = p[r, (j - sign * r) mod r_pad] for p of shape (rows, r_pad)."""
    out = p
    for b, m in enumerate(masks):
        rolled = pltpu.roll(out, (sign * (1 << b)) % r_pad, axis=1)
        out = jnp.where(m, rolled, out)
    return out


def _skew_cols(p, sign, masks, r_pad):
    """out[i, c] = p[(i - sign * c) mod r_pad, c] for p of shape (r_pad, cols)."""
    out = p
    for b, m in enumerate(masks):
        rolled = pltpu.roll(out, (sign * (1 << b)) % r_pad, axis=0)
        out = jnp.where(m, rolled, out)
    return out


# ----------------------------------- kernel ------------------------------------

def _axial_group_kernel(x_ref, wq_ref, wk_ref, wv_ref, eq_ref, ek_ref, ev_ref,
                        o_ref, *, heads_per_group, r_pad):
    L = x_ref.shape[1]                       # query length == memory length
    x = x_ref[0]                             # (L, C) f32

    eq = eq_ref[...]                         # (r_pad, dk) f32, packed, BN folded
    ek = ek_ref[...]                         # (r_pad, dk) f32, flipped + packed
    ev = ev_ref[...]                         # (r_pad, dv) f32, packed

    # Hoisted skew machinery: one iota + one mask set per grid step, shared by
    # all three skews and every head of the group (JAX does not CSE iotas).
    n_bits = max(1, (L - 1).bit_length())
    ridx = jax.lax.broadcasted_iota(jnp.int32, (L, r_pad), 0)
    row_masks = [(ridx & (1 << b)) != 0 for b in range(n_bits)]
    cidx = jax.lax.broadcasted_iota(jnp.int32, (r_pad, L), 1)
    col_masks = [(cidx & (1 << b)) != 0 for b in range(n_bits)]
    pad_zeros = jnp.zeros((L, r_pad - L), jnp.float32)   # reused by every head

    outs = []
    # TODO(synk): for heads_per_group > 1 the shared-table matmuls + skews could
    # be batched by stacking heads along sublanes (one skew pass per group).
    for j in range(heads_per_group):
        # Column-blocked per-head projections (lane-aligned, no qkv slicing).
        q = jnp.dot(x, wq_ref[j], preferred_element_type=jnp.float32)    # (L, dk)
        k = jnp.dot(x, wk_ref[j], preferred_element_type=jnp.float32)    # (L, dk)
        v = jnp.dot(x, wv_ref[j], preferred_element_type=jnp.float32)    # (L, dv)

        # content similarity: q @ k^T                                     (MXU)
        content = jax.lax.dot_general(
            q, k, (((1,), (1,)), ((), ())),
            preferred_element_type=jnp.float32)                           # (L, L)

        # query-RPE similarity: (L,dk)@(dk,r_pad), then rel->abs skew (MXU+XLU)
        pq = jax.lax.dot_general(
            q, eq, (((1,), (1,)), ((), ())),
            preferred_element_type=jnp.float32)                           # (L, r_pad)
        qsim = _skew_rows(pq, 1, row_masks, r_pad)[:, :L]                 # (L, L)

        # key-RPE similarity: (r_pad,dk)@(dk,L), then skew along rows (MXU+XLU)
        pk = jax.lax.dot_general(
            ek, k, (((1,), (1,)), ((), ())),
            preferred_element_type=jnp.float32)                           # (r_pad, L)
        ksim = _skew_cols(pk, 1, col_masks, r_pad)[:L, :]                 # (L, L)

        # similarity BatchNorm is folded into the weight / table scales.
        logits = content + qsim + ksim
        m_max = jnp.max(logits, axis=-1, keepdims=True)
        e = jnp.exp(logits - m_max)
        denom = jnp.sum(e, axis=-1, keepdims=True)
        weights = e * pl.reciprocal(denom, approx=True)                   # (L, L)

        # retrieve content: weights @ v                                    (MXU)
        rc = jnp.dot(weights, v, preferred_element_type=jnp.float32)      # (L, dv)

        # retrieve value-RPE: abs->rel skew of weights, matmul with packed table
        wp = jnp.concatenate([weights, pad_zeros], axis=1)                # (L, r_pad)
        wrel = _skew_rows(wp, -1, row_masks, r_pad)                       # (L, r_pad)
        rr = jnp.dot(wrel, ev, preferred_element_type=jnp.float32)        # (L, dv)

        outs.append(rc + rr)        # retrieved-output BN folded into the params

    # One lane-dense store per head group: (L, heads_per_group * dv).
    slab = outs[0] if len(outs) == 1 else jnp.concatenate(outs, axis=-1)
    o_ref[0] = slab.astype(o_ref.dtype)


# ----------------------------------- wrapper -----------------------------------

def _heads_per_group(num_heads, dv):
    """Smallest divisor of num_heads whose output slab is a 128-lane multiple."""
    for hpg in range(1, num_heads + 1):
        if num_heads % hpg == 0 and (hpg * dv) % 128 == 0:
            return hpg
    return num_heads


def _pack_rpe_table(table, scale, seq_len, r_pad, flip=False):
    """Slice the 2L-1 rows actually used by a length-L sequence (relative
    distances -(L-1)..L-1, centered at K_REL), optionally flip (key table),
    scale (BN fold), zero-pad to r_pad rows and pre-rotate by -(L-1) so the
    in-kernel skew needs no base rotation."""
    c = seq_len - 1
    sub = table[K_REL - c:K_REL + c + 1] * scale              # (2L-1, depth)
    if flip:
        sub = sub[::-1]
    depth = sub.shape[1]
    padded = jnp.zeros((r_pad, depth), jnp.float32).at[:2 * seq_len - 1].set(
        sub.astype(jnp.float32))
    return jnp.roll(padded, -c, axis=0)


def axial_attention_forward(x, params, *, num_heads, total_key_depth,
                            total_value_depth):
    B, L, C = x.shape
    if L > MAX_SPAN:
        raise NotImplementedError("sequence length > MAX_SPAN not supported")
    Dk, Dv = total_key_depth, total_value_depth
    H = num_heads
    dk, dv = Dk // H, Dv // H
    hpg = _heads_per_group(H, dv)
    G = H // hpg
    r_pad = max(128, _round_up(2 * L - 1, 128))   # adaptive RPE pad width

    # Fold all eval-mode BatchNorm scales into the parameters (one-time) and
    # split the QKV weight per head so the kernel never does lane-misaligned
    # slicing of a wide qkv buffer.
    s = BN_SCALE
    W = params["qkv_kernel"].astype(jnp.float32)                     # (C, 2Dk+Dv)
    wq = (W[:, :Dk] * s ** 1.5).reshape(C, H, dk).transpose(1, 0, 2)      # (H,C,dk)
    wk = (W[:, Dk:2 * Dk] * s ** 1.5).reshape(C, H, dk).transpose(1, 0, 2)
    wv = (W[:, 2 * Dk:] * s ** 2).reshape(C, H, dv).transpose(1, 0, 2)    # (H,C,dv)

    eq_t = _pack_rpe_table(params["query_rpe"], s ** 0.5, L, r_pad)
    ek_t = _pack_rpe_table(params["key_rpe"], s ** 0.5, L, r_pad, flip=True)
    ev_t = _pack_rpe_table(params["value_rpe"], s, L, r_pad)

    kernel = functools.partial(_axial_group_kernel,
                               heads_per_group=hpg, r_pad=r_pad)

    return pl.pallas_call(
        kernel,
        out_shape=jax.ShapeDtypeStruct((B, L, Dv), x.dtype),
        grid=(B, G),
        in_specs=[
            pl.BlockSpec((1, L, C), lambda b, g: (b, 0, 0)),        # resident over g
            pl.BlockSpec((hpg, C, dk), lambda b, g: (g, 0, 0)),     # query weights
            pl.BlockSpec((hpg, C, dk), lambda b, g: (g, 0, 0)),     # key weights
            pl.BlockSpec((hpg, C, dv), lambda b, g: (g, 0, 0)),     # value weights
            pl.BlockSpec((r_pad, dk), lambda b, g: (0, 0)),         # query RPE table
            pl.BlockSpec((r_pad, dk), lambda b, g: (0, 0)),         # key RPE table
            pl.BlockSpec((r_pad, dv), lambda b, g: (0, 0)),         # value RPE table
        ],
        out_specs=pl.BlockSpec((1, L, hpg * dv), lambda b, g: (b, 0, g)),
        compiler_params=pltpu.CompilerParams(
            dimension_semantics=("parallel", "parallel"),
            # fits v7x's 64 MiB VMEM; plenty for the per-group working set
            vmem_limit_bytes=48 * 1024 * 1024),
    )(x.astype(jnp.float32), wq, wk, wv, eq_t, ek_t, ev_t)


# ------------------------------ pure-JAX reference ------------------------------

def _relative_distance_matrix(query_length, key_length):
    key_index = jnp.arange(key_length)
    query_index = jnp.arange(query_length) + (key_length - query_length) // 2
    dist = key_index[None, :] - query_index[:, None] + (MAX_SPAN - 1)
    if query_length + (key_length - query_length) // 2 > MAX_SPAN:
        dist = jnp.clip(dist, 0, MAX_SPAN * 2 - 2)
    return dist


def _gather_rpe(embeddings, query_length, key_length):
    return embeddings[_relative_distance_matrix(query_length, key_length)]


def axial_attention_ref(x, params, *, num_heads, total_key_depth,
                        total_value_depth):
    B, L, C = x.shape
    Dk, Dv = total_key_depth, total_value_depth
    H = num_heads
    dk, dv = Dk // H, Dv // H
    M = L
    hi = jax.lax.Precision.HIGHEST

    def mm(eq, a, b):
        return jnp.einsum(eq, a.astype(jnp.float32), b.astype(jnp.float32),
                          precision=hi)

    qkv = mm("nlc,cd->nld", x, params["qkv_kernel"]) * BN_SCALE
    query, key, value = qkv[..., :Dk], qkv[..., Dk:2 * Dk], qkv[..., 2 * Dk:]
    q = query.reshape(B, L, H, dk).transpose(0, 2, 1, 3)
    k = key.reshape(B, M, H, dk).transpose(0, 2, 1, 3)
    v = value.reshape(B, M, H, dv).transpose(0, 2, 1, 3)

    qrpe = _gather_rpe(params["query_rpe"], L, M)
    krpe = _gather_rpe(params["key_rpe"], L, M)
    vrpe = _gather_rpe(params["value_rpe"], L, M)

    content = mm("bhld,bhmd->bhlm", q, k)
    qsim = mm("bhld,lmd->bhlm", q, qrpe)
    ksim = mm("bhmd,lmd->bhlm", k, krpe)
    logits = (content + qsim + ksim) * BN_SCALE
    weights = jax.nn.softmax(logits, axis=-1)

    rc = mm("bhlm,bhmd->bhld", weights, v)
    rr = mm("bhlm,lmd->bhld", weights, vrpe)
    out = (rc + rr) * BN_SCALE
    return out.transpose(0, 2, 1, 3).reshape(B, L, Dv)


# ------------------------------------- main --------------------------------------

if __name__ == "__main__":
    # Small shapes consistent with the module (query_shape >= seq_len branch).
    B, L, C = 2, 16, 8
    num_heads = 2
    total_key_depth = 16        # dk = 8 per head
    total_value_depth = 32      # dv = 16 per head
    dk = total_key_depth // num_heads
    dv = total_value_depth // num_heads
    Dout = 2 * total_key_depth + total_value_depth

    root = jax.random.PRNGKey(0)
    kx, kw, kq, kk, kv = jax.random.split(root, 5)

    x = jax.random.normal(kx, (B, L, C), jnp.float32)
    params = {
        # intended shape of qkv_kernel: (C, 2*Dk + Dv), std = Dk^-0.5
        "qkv_kernel": jax.random.normal(kw, (C, Dout), jnp.float32)
                      * (total_key_depth ** -0.5),
        # RPE embedding tables: (2*MAX_SPAN - 1, depth), std = 1.0
        "query_rpe": jax.random.normal(kq, (R_TAB, dk), jnp.float32),
        "key_rpe": jax.random.normal(kk, (R_TAB, dk), jnp.float32),
        "value_rpe": jax.random.normal(kv, (R_TAB, dv), jnp.float32),
    }

    out = axial_attention_forward(
        x, params, num_heads=num_heads,
        total_key_depth=total_key_depth, total_value_depth=total_value_depth)
    out = jax.block_until_ready(out)

    ref = axial_attention_ref(
        x, params, num_heads=num_heads,
        total_key_depth=total_key_depth, total_value_depth=total_value_depth)
    ref = jax.block_until_ready(ref)

    assert out.shape == (B, L, total_value_depth), out.shape
    max_err = float(jnp.max(jnp.abs(out - ref)))
    scale = max(1.0, float(jnp.max(jnp.abs(ref))))
    assert max_err <= 2e-2 * scale, f"mismatch: max_err={max_err}"

    print("KERNEL_OK")
</pallas_src>

<mosaic_0001>
module attributes {stable_mosaic.version = 11 : i64} {
  func.func @_axial_group_kernel(%arg0: i32, %arg1: i32, %arg2: memref<1x16x8xf32, #tpu.memory_space<vmem>>, %arg3: memref<2x8x8xf32, #tpu.memory_space<vmem>>, %arg4: memref<2x8x8xf32, #tpu.memory_space<vmem>>, %arg5: memref<2x8x16xf32, #tpu.memory_space<vmem>>, %arg6: memref<128x8xf32, #tpu.memory_space<vmem>>, %arg7: memref<128x8xf32, #tpu.memory_space<vmem>>, %arg8: memref<128x16xf32, #tpu.memory_space<vmem>>, %arg9: memref<1x16x32xf32, #tpu.memory_space<vmem>>) attributes {dimension_semantics = [#tpu.dimension_semantics<parallel>, #tpu.dimension_semantics<parallel>], iteration_bounds = array<i64: 2, 1>, scalar_prefetch = 0 : i64, scratch_operands = 0 : i64, tpu.core_type = #tpu.core_type<tc>, window_params = [{transform_indices = @transform_0, window_bounds = array<i64: 1, 16, 8>}, {transform_indices = @transform_1, window_bounds = array<i64: 2, 8, 8>}, {transform_indices = @transform_2, window_bounds = array<i64: 2, 8, 8>}, {transform_indices = @transform_3, window_bounds = array<i64: 2, 8, 16>}, {pipeline_mode = #tpu.pipeline_mode<synchronous>, transform_indices = @transform_4, window_bounds = array<i64: 128, 8>}, {pipeline_mode = #tpu.pipeline_mode<synchronous>, transform_indices = @transform_5, window_bounds = array<i64: 128, 8>}, {pipeline_mode = #tpu.pipeline_mode<synchronous>, transform_indices = @transform_6, window_bounds = array<i64: 128, 16>}, {transform_indices = @transform_7, window_bounds = array<i64: 1, 16, 32>}]} {
    %c0 = arith.constant 0 : index
    %c0_0 = arith.constant 0 : index
    %c0_1 = arith.constant 0 : index
    %0 = vector.load %arg2[%c0, %c0_0, %c0_1] : memref<1x16x8xf32, #tpu.memory_space<vmem>>, vector<1x16x8xf32>
    %1 = vector.shape_cast %0 : vector<1x16x8xf32> to vector<16x8xf32>
    %c0_2 = arith.constant 0 : index
    %c0_3 = arith.constant 0 : index
    %2 = vector.load %arg6[%c0_2, %c0_3] : memref<128x8xf32, #tpu.memory_space<vmem>>, vector<128x8xf32>
    %c0_4 = arith.constant 0 : index
    %c0_5 = arith.constant 0 : index
    %3 = vector.load %arg7[%c0_4, %c0_5] : memref<128x8xf32, #tpu.memory_space<vmem>>, vector<128x8xf32>
    %c0_6 = arith.constant 0 : index
    %c0_7 = arith.constant 0 : index
    %4 = vector.load %arg8[%c0_6, %c0_7] : memref<128x16xf32, #tpu.memory_space<vmem>>, vector<128x16xf32>
    %5 = tpu.iota {dimensions = array<i32: 0>} : vector<16x128xi32>
    %c1_i32 = arith.constant 1 : i32
    %6 = vector.broadcast %c1_i32 : i32 to vector<16x128xi32>
    %7 = arith.andi %5, %6 : vector<16x128xi32>
    %c0_i32 = arith.constant 0 : i32
    %8 = vector.broadcast %c0_i32 : i32 to vector<16x128xi32>
    %9 = arith.cmpi ne, %7, %8 : vector<16x128xi32>
    %c2_i32 = arith.constant 2 : i32
    %10 = vector.broadcast %c2_i32 : i32 to vector<16x128xi32>
    %11 = arith.andi %5, %10 : vector<16x128xi32>
    %c0_i32_8 = arith.constant 0 : i32
    %12 = vector.broadcast %c0_i32_8 : i32 to vector<16x128xi32>
    %13 = arith.cmpi ne, %11, %12 : vector<16x128xi32>
    %c4_i32 = arith.constant 4 : i32
    %14 = vector.broadcast %c4_i32 : i32 to vector<16x128xi32>
    %15 = arith.andi %5, %14 : vector<16x128xi32>
    %c0_i32_9 = arith.constant 0 : i32
    %16 = vector.broadcast %c0_i32_9 : i32 to vector<16x128xi32>
    %17 = arith.cmpi ne, %15, %16 : vector<16x128xi32>
    %c8_i32 = arith.constant 8 : i32
    %18 = vector.broadcast %c8_i32 : i32 to vector<16x128xi32>
    %19 = arith.andi %5, %18 : vector<16x128xi32>
    %c0_i32_10 = arith.constant 0 : i32
    %20 = vector.broadcast %c0_i32_10 : i32 to vector<16x128xi32>
    %21 = arith.cmpi ne, %19, %20 : vector<16x128xi32>
    %22 = tpu.iota {dimensions = array<i32: 1>} : vector<128x16xi32>
    %c1_i32_11 = arith.constant 1 : i32
    %23 = vector.broadcast %c1_i32_11 : i32 to vector<128x16xi32>
    %24 = arith.andi %22, %23 : vector<128x16xi32>
    %c0_i32_12 = arith.constant 0 : i32
    %25 = vector.broadcast %c0_i32_12 : i32 to vector<128x16xi32>
    %26 = arith.cmpi ne, %24, %25 : vector<128x16xi32>
    %c2_i32_13 = arith.constant 2 : i32
    %27 = vector.broadcast %c2_i32_13 : i32 to vector<128x16xi32>
    %28 = arith.andi %22, %27 : vector<128x16xi32>
    %c0_i32_14 = arith.constant 0 : i32
    %29 = vector.broadcast %c0_i32_14 : i32 to vector<128x16xi32>
    %30 = arith.cmpi ne, %28, %29 : vector<128x16xi32>
    %c4_i32_15 = arith.constant 4 : i32
    %31 = vector.broadcast %c4_i32_15 : i32 to vector<128x16xi32>
    %32 = arith.andi %22, %31 : vector<128x16xi32>
    %c0_i32_16 = arith.constant 0 : i32
    %33 = vector.broadcast %c0_i32_16 : i32 to vector<128x16xi32>
    %34 = arith.cmpi ne, %32, %33 : vector<128x16xi32>
    %c8_i32_17 = arith.constant 8 : i32
    %35 = vector.broadcast %c8_i32_17 : i32 to vector<128x16xi32>
    %36 = arith.andi %22, %35 : vector<128x16xi32>
    %c0_i32_18 = arith.constant 0 : i32
    %37 = vector.broadcast %c0_i32_18 : i32 to vector<128x16xi32>
    %38 = arith.cmpi ne, %36, %37 : vector<128x16xi32>
    %cst = arith.constant 0.000000e+00 : f32
    %39 = vector.broadcast %cst : f32 to vector<16x112xf32>
    %c0_19 = arith.constant 0 : index
    %c0_20 = arith.constant 0 : index
    %c0_21 = arith.constant 0 : index
    %40 = vector.load %arg3[%c0_19, %c0_20, %c0_21] : memref<2x8x8xf32, #tpu.memory_space<vmem>>, vector<1x8x8xf32>
    %41 = vector.shape_cast %40 : vector<1x8x8xf32> to vector<8x8xf32>
    %cst_22 = arith.constant dense<0.000000e+00> : vector<16x8xf32>
    %42 = tpu.matmul %1, %41, %cst_22 {dimension_numbers = #tpu.dot_dimension_numbers<[1], [0], [0], [1], [0, 0, 1, 1], [], []>} : vector<16x8xf32>, vector<8x8xf32>, vector<16x8xf32> -> vector<16x8xf32>
    %c0_23 = arith.constant 0 : index
    %c0_24 = arith.constant 0 : index
    %c0_25 = arith.constant 0 : index
    %43 = vector.load %arg4[%c0_23, %c0_24, %c0_25] : memref<2x8x8xf32, #tpu.memory_space<vmem>>, vector<1x8x8xf32>
    %44 = vector.shape_cast %43 : vector<1x8x8xf32> to vector<8x8xf32>
    %cst_26 = arith.constant dense<0.000000e+00> : vector<16x8xf32>
    %45 = tpu.matmul %1, %44, %cst_26 {dimension_numbers = #tpu.dot_dimension_numbers<[1], [0], [0], [1], [0, 0, 1, 1], [], []>} : vector<16x8xf32>, vector<8x8xf32>, vector<16x8xf32> -> vector<16x8xf32>
    %c0_27 = arith.constant 0 : index
    %c0_28 = arith.constant 0 : index
    %c0_29 = arith.constant 0 : index
    %46 = vector.load %arg5[%c0_27, %c0_28, %c0_29] : memref<2x8x16xf32, #tpu.memory_space<vmem>>, vector<1x8x16xf32>
    %47 = vector.shape_cast %46 : vector<1x8x16xf32> to vector<8x16xf32>
    %cst_30 = arith.constant dense<0.000000e+00> : vector<16x16xf32>
    %48 = tpu.matmul %1, %47, %cst_30 {dimension_numbers = #tpu.dot_dimension_numbers<[1], [0], [0], [1], [0, 0, 1, 1], [], []>} : vector<16x8xf32>, vector<8x16xf32>, vector<16x16xf32> -> vector<16x16xf32>
    %cst_31 = arith.constant dense<0.000000e+00> : vector<16x16xf32>
    %49 = tpu.matmul %42, %45, %cst_31 {dimension_numbers = #tpu.dot_dimension_numbers<[1], [1], [0], [0], [0, 0, 1, 0], [], []>} : vector<16x8xf32>, vector<16x8xf32>, vector<16x16xf32> -> vector<16x16xf32>
    %cst_32 = arith.constant dense<0.000000e+00> : vector<16x128xf32>
    %50 = tpu.matmul %42, %2, %cst_32 {dimension_numbers = #tpu.dot_dimension_numbers<[1], [1], [0], [0], [0, 0, 1, 0], [], []>} : vector<16x8xf32>, vector<128x8xf32>, vector<16x128xf32> -> vector<16x128xf32>
    %c1_i32_33 = arith.constant 1 : i32
    %51 = tpu.dynamic_rotate %50 by %c1_i32_33 dim 1 : vector<16x128xf32>, i32 -> vector<16x128xf32>
    %52 = arith.select %9, %51, %50 : vector<16x128xi1>, vector<16x128xf32>
    %c2_i32_34 = arith.constant 2 : i32
    %53 = tpu.dynamic_rotate %52 by %c2_i32_34 dim 1 : vector<16x128xf32>, i32 -> vector<16x128xf32>
    %54 = arith.select %13, %53, %52 : vector<16x128xi1>, vector<16x128xf32>
    %c4_i32_35 = arith.constant 4 : i32
    %55 = tpu.dynamic_rotate %54 by %c4_i32_35 dim 1 : vector<16x128xf32>, i32 -> vector<16x128xf32>
    %56 = arith.select %17, %55, %54 : vector<16x128xi1>, vector<16x128xf32>
    %c8_i32_36 = arith.constant 8 : i32
    %57 = tpu.dynamic_rotate %56 by %c8_i32_36 dim 1 : vector<16x128xf32>, i32 -> vector<16x128xf32>
    %58 = arith.select %21, %57, %56 : vector<16x128xi1>, vector<16x128xf32>
    %59 = vector.extract_strided_slice %58 {offsets = [0, 0], sizes = [16, 16], strides = [1, 1]} : vector<16x128xf32> to vector<16x16xf32>
    %cst_37 = arith.constant dense<0.000000e+00> : vector<128x16xf32>
    %60 = tpu.matmul %3, %45, %cst_37 {dimension_numbers = #tpu.dot_dimension_numbers<[1], [1], [0], [0], [0, 0, 1, 0], [], []>} : vector<128x8xf32>, vector<16x8xf32>, vector<128x16xf32> -> vector<128x16xf32>
    %c1_i32_38 = arith.constant 1 : i32
    %61 = tpu.dynamic_rotate %60 by %c1_i32_38 dim 0 : vector<128x16xf32>, i32 -> vector<128x16xf32>
    %62 = arith.select %26, %61, %60 : vector<128x16xi1>, vector<128x16xf32>
    %c2_i32_39 = arith.constant 2 : i32
    %63 = tpu.dynamic_rotate %62 by %c2_i32_39 dim 0 : vector<128x16xf32>, i32 -> vector<128x16xf32>
    %64 = arith.select %30, %63, %62 : vector<128x16xi1>, vector<128x16xf32>
    %c4_i32_40 = arith.constant 4 : i32
    %65 = tpu.dynamic_rotate %64 by %c4_i32_40 dim 0 : vector<128x16xf32>, i32 -> vector<128x16xf32>
    %66 = arith.select %34, %65, %64 : vector<128x16xi1>, vector<128x16xf32>
    %c8_i32_41 = arith.constant 8 : i32
    %67 = tpu.dynamic_rotate %66 by %c8_i32_41 dim 0 : vector<128x16xf32>, i32 -> vector<128x16xf32>
    %68 = arith.select %38, %67, %66 : vector<128x16xi1>, vector<128x16xf32>
    %69 = vector.extract_strided_slice %68 {offsets = [0, 0], sizes = [16, 16], strides = [1, 1]} : vector<128x16xf32> to vector<16x16xf32>
    %70 = arith.addf %49, %59 : vector<16x16xf32>
    %71 = arith.addf %70, %69 : vector<16x16xf32>
    %cst_42 = arith.constant dense<0xFF800000> : vector<16xf32>
    %72 = vector.multi_reduction <maximumf>, %71, %cst_42 [1] : vector<16x16xf32> to vector<16xf32>
    %73 = vector.shape_cast %72 : vector<16xf32> to vector<16x1xf32>
    %74 = vector.broadcast %73 : vector<16x1xf32> to vector<16x16xf32>
    %75 = arith.subf %71, %74 : vector<16x16xf32>
    %76 = math.exp %75 : vector<16x16xf32>
    %cst_43 = arith.constant dense<0.000000e+00> : vector<16xf32>
    %77 = vector.multi_reduction <add>, %76, %cst_43 [1] : vector<16x16xf32> to vector<16xf32>
    %78 = vector.shape_cast %77 : vector<16xf32> to vector<16x1xf32>
    %79 = tpu.reciprocal %78 {approx = true} : vector<16x1xf32> -> vector<16x1xf32>
    %80 = vector.broadcast %79 : vector<16x1xf32> to vector<16x16xf32>
    %81 = arith.mulf %76, %80 : vector<16x16xf32>
    %cst_44 = arith.constant dense<0.000000e+00> : vector<16x16xf32>
    %82 = tpu.matmul %81, %48, %cst_44 {dimension_numbers = #tpu.dot_dimension_numbers<[1], [0], [0], [1], [0, 0, 1, 1], [], []>} : vector<16x16xf32>, vector<16x16xf32>, vector<16x16xf32> -> vector<16x16xf32>
    %83 = tpu.concatenate %81, %39 in 1 : vector<16x16xf32>, vector<16x112xf32> -> vector<16x128xf32>
    %c127_i32 = arith.constant 127 : i32
    %84 = tpu.dynamic_rotate %83 by %c127_i32 dim 1 : vector<16x128xf32>, i32 -> vector<16x128xf32>
    %85 = arith.select %9, %84, %83 : vector<16x128xi1>, vector<16x128xf32>
    %c126_i32 = arith.constant 126 : i32
    %86 = tpu.dynamic_rotate %85 by %c126_i32 dim 1 : vector<16x128xf32>, i32 -> vector<16x128xf32>
    %87 = arith.select %13, %86, %85 : vector<16x128xi1>, vector<16x128xf32>
    %c124_i32 = arith.constant 124 : i32
    %88 = tpu.dynamic_rotate %87 by %c124_i32 dim 1 : vector<16x128xf32>, i32 -> vector<16x128xf32>
    %89 = arith.select %17, %88, %87 : vector<16x128xi1>, vector<16x128xf32>
    %c120_i32 = arith.constant 120 : i32
    %90 = tpu.dynamic_rotate %89 by %c120_i32 dim 1 : vector<16x128xf32>, i32 -> vector<16x128xf32>
    %91 = arith.select %21, %90, %89 : vector<16x128xi1>, vector<16x128xf32>
    %cst_45 = arith.constant dense<0.000000e+00> : vector<16x16xf32>
    %92 = tpu.matmul %91, %4, %cst_45 {dimension_numbers = #tpu.dot_dimension_numbers<[1], [0], [0], [1], [0, 0, 1, 1], [], []>} : vector<16x128xf32>, vector<128x16xf32>, vector<16x16xf32> -> vector<16x16xf32>
    %93 = arith.addf %82, %92 : vector<16x16xf32>
    %c1 = arith.constant 1 : index
    %c0_46 = arith.constant 0 : index
    %c0_47 = arith.constant 0 : index
    %94 = vector.load %arg3[%c1, %c0_46, %c0_47] : memref<2x8x8xf32, #tpu.memory_space<vmem>>, vector<1x8x8xf32>
    %95 = vector.shape_cast %94 : vector<1x8x8xf32> to vector<8x8xf32>
    %cst_48 = arith.constant dense<0.000000e+00> : vector<16x8xf32>
    %96 = tpu.matmul %1, %95, %cst_48 {dimension_numbers = #tpu.dot_dimension_numbers<[1], [0], [0], [1], [0, 0, 1, 1], [], []>} : vector<16x8xf32>, vector<8x8xf32>, vector<16x8xf32> -> vector<16x8xf32>
    %c1_49 = arith.constant 1 : index
    %c0_50 = arith.constant 0 : index
    %c0_51 = arith.constant 0 : index
    %97 = vector.load %arg4[%c1_49, %c0_50, %c0_51] : memref<2x8x8xf32, #tpu.memory_space<vmem>>, vector<1x8x8xf32>
    %98 = vector.shape_cast %97 : vector<1x8x8xf32> to vector<8x8xf32>
    %cst_52 = arith.constant dense<0.000000e+00> : vector<16x8xf32>
    %99 = tpu.matmul %1, %98, %cst_52 {dimension_numbers = #tpu.dot_dimension_numbers<[1], [0], [0], [1], [0, 0, 1, 1], [], []>} : vector<16x8xf32>, vector<8x8xf32>, vector<16x8xf32> -> vector<16x8xf32>
    %c1_53 = arith.constant 1 : index
    %c0_54 = arith.constant 0 : index
    %c0_55 = arith.constant 0 : index
    %100 = vector.load %arg5[%c1_53, %c0_54, %c0_55] : memref<2x8x16xf32, #tpu.memory_space<vmem>>, vector<1x8x16xf32>
    %101 = vector.shape_cast %100 : vector<1x8x16xf32> to vector<8x16xf32>
    %cst_56 = arith.constant dense<0.000000e+00> : vector<16x16xf32>
    %102 = tpu.matmul %1, %101, %cst_56 {dimension_numbers = #tpu.dot_dimension_numbers<[1], [0], [0], [1], [0, 0, 1, 1], [], []>} : vector<16x8xf32>, vector<8x16xf32>, vector<16x16xf32> -> vector<16x16xf32>
    %cst_57 = arith.constant dense<0.000000e+00> : vector<16x16xf32>
    %103 = tpu.matmul %96, %99, %cst_57 {dimension_numbers = #tpu.dot_dimension_numbers<[1], [1], [0], [0], [0, 0, 1, 0], [], []>} : vector<16x8xf32>, vector<16x8xf32>, vector<16x16xf32> -> vector<16x16xf32>
    %cst_58 = arith.constant dense<0.000000e+00> : vector<16x128xf32>
    %104 = tpu.matmul %96, %2, %cst_58 {dimension_numbers = #tpu.dot_dimension_numbers<[1], [1], [0], [0], [0, 0, 1, 0], [], []>} : vector<16x8xf32>, vector<128x8xf32>, vector<16x128xf32> -> vector<16x128xf32>
    %c1_i32_59 = arith.constant 1 : i32
    %105 = tpu.dynamic_rotate %104 by %c1_i32_59 dim 1 : vector<16x128xf32>, i32 -> vector<16x128xf32>
    %106 = arith.select %9, %105, %104 : vector<16x128xi1>, vector<16x128xf32>
    %c2_i32_60 = arith.constant 2 : i32
    %107 = tpu.dynamic_rotate %106 by %c2_i32_60 dim 1 : vector<16x128xf32>, i32 -> vector<16x128xf32>
    %108 = arith.select %13, %107, %106 : vector<16x128xi1>, vector<16x128xf32>
    %c4_i32_61 = arith.constant 4 : i32
    %109 = tpu.dynamic_rotate %108 by %c4_i32_61 dim 1 : vector<16x128xf32>, i32 -> vector<16x128xf32>
    %110 = arith.select %17, %109, %108 : vector<16x128xi1>, vector<16x128xf32>
    %c8_i32_62 = arith.constant 8 : i32
    %111 = tpu.dynamic_rotate %110 by %c8_i32_62 dim 1 : vector<16x128xf32>, i32 -> vector<16x128xf32>
    %112 = arith.select %21, %111, %110 : vector<16x128xi1>, vector<16x128xf32>
    %113 = vector.extract_strided_slice %112 {offsets = [0, 0], sizes = [16, 16], strides = [1, 1]} : vector<16x128xf32> to vector<16x16xf32>
    %cst_63 = arith.constant dense<0.000000e+00> : vector<128x16xf32>
    %114 = tpu.matmul %3, %99, %cst_63 {dimension_numbers = #tpu.dot_dimension_numbers<[1], [1], [0], [0], [0, 0, 1, 0], [], []>} : vector<128x8xf32>, vector<16x8xf32>, vector<128x16xf32> -> vector<128x16xf32>
    %c1_i32_64 = arith.constant 1 : i32
    %115 = tpu.dynamic_rotate %114 by %c1_i32_64 dim 0 : vector<128x16xf32>, i32 -> vector<128x16xf32>
    %116 = arith.select %26, %115, %114 : vector<128x16xi1>, vector<128x16xf32>
    %c2_i32_65 = arith.constant 2 : i32
    %117 = tpu.dynamic_rotate %116 by %c2_i32_65 dim 0 : vector<128x16xf32>, i32 -> vector<128x16xf32>
    %118 = arith.select %30, %117, %116 : vector<128x16xi1>, vector<128x16xf32>
    %c4_i32_66 = arith.constant 4 : i32
    %119 = tpu.dynamic_rotate %118 by %c4_i32_66 dim 0 : vector<128x16xf32>, i32 -> vector<128x16xf32>
    %120 = arith.select %34, %119, %118 : vector<128x16xi1>, vector<128x16xf32>
    %c8_i32_67 = arith.constant 8 : i32
    %121 = tpu.dynamic_rotate %120 by %c8_i32_67 dim 0 : vector<128x16xf32>, i32 -> vector<128x16xf32>
    %122 = arith.select %38, %121, %120 : vector<128x16xi1>, vector<128x16xf32>
    %123 = vector.extract_strided_slice %122 {offsets = [0, 0], sizes = [16, 16], strides = [1, 1]} : vector<128x16xf32> to vector<16x16xf32>
    %124 = arith.addf %103, %113 : vector<16x16xf32>
    %125 = arith.addf %124, %123 : vector<16x16xf32>
    %cst_68 = arith.constant dense<0xFF800000> : vector<16xf32>
    %126 = vector.multi_reduction <maximumf>, %125, %cst_68 [1] : vector<16x16xf32> to vector<16xf32>
    %127 = vector.shape_cast %126 : vector<16xf32> to vector<16x1xf32>
    %128 = vector.broadcast %127 : vector<16x1xf32> to vector<16x16xf32>
    %129 = arith.subf %125, %128 : vector<16x16xf32>
    %130 = math.exp %129 : vector<16x16xf32>
    %cst_69 = arith.constant dense<0.000000e+00> : vector<16xf32>
    %131 = vector.multi_reduction <add>, %130, %cst_69 [1] : vector<16x16xf32> to vector<16xf32>
    %132 = vector.shape_cast %131 : vector<16xf32> to vector<16x1xf32>
    %133 = tpu.reciprocal %132 {approx = true} : vector<16x1xf32> -> vector<16x1xf32>
    %134 = vector.broadcast %133 : vector<16x1xf32> to vector<16x16xf32>
    %135 = arith.mulf %130, %134 : vector<16x16xf32>
    %cst_70 = arith.constant dense<0.000000e+00> : vector<16x16xf32>
    %136 = tpu.matmul %135, %102, %cst_70 {dimension_numbers = #tpu.dot_dimension_numbers<[1], [0], [0], [1], [0, 0, 1, 1], [], []>} : vector<16x16xf32>, vector<16x16xf32>, vector<16x16xf32> -> vector<16x16xf32>
    %137 = tpu.concatenate %135, %39 in 1 : vector<16x16xf32>, vector<16x112xf32> -> vector<16x128xf32>
    %c127_i32_71 = arith.constant 127 : i32
    %138 = tpu.dynamic_rotate %137 by %c127_i32_71 dim 1 : vector<16x128xf32>, i32 -> vector<16x128xf32>
    %139 = arith.select %9, %138, %137 : vector<16x128xi1>, vector<16x128xf32>
    %c126_i32_72 = arith.constant 126 : i32
    %140 = tpu.dynamic_rotate %139 by %c126_i32_72 dim 1 : vector<16x128xf32>, i32 -> vector<16x128xf32>
    %141 = arith.select %13, %140, %139 : vector<16x128xi1>, vector<16x128xf32>
    %c124_i32_73 = arith.constant 124 : i32
    %142 = tpu.dynamic_rotate %141 by %c124_i32_73 dim 1 : vector<16x128xf32>, i32 -> vector<16x128xf32>
    %143 = arith.select %17, %142, %141 : vector<16x128xi1>, vector<16x128xf32>
    %c120_i32_74 = arith.constant 120 : i32
    %144 = tpu.dynamic_rotate %143 by %c120_i32_74 dim 1 : vector<16x128xf32>, i32 -> vector<16x128xf32>
    %145 = arith.select %21, %144, %143 : vector<16x128xi1>, vector<16x128xf32>
    %cst_75 = arith.constant dense<0.000000e+00> : vector<16x16xf32>
    %146 = tpu.matmul %145, %4, %cst_75 {dimension_numbers = #tpu.dot_dimension_numbers<[1], [0], [0], [1], [0, 0, 1, 1], [], []>} : vector<16x128xf32>, vector<128x16xf32>, vector<16x16xf32> -> vector<16x16xf32>
    %147 = arith.addf %136, %146 : vector<16x16xf32>
    %148 = tpu.concatenate %93, %147 in 1 : vector<16x16xf32>, vector<16x16xf32> -> vector<16x32xf32>
    %c0_76 = arith.constant 0 : index
    %c0_77 = arith.constant 0 : index
    %c0_78 = arith.constant 0 : index
    %149 = vector.load %arg9[%c0_76, %c0_77, %c0_78] : memref<1x16x32xf32, #tpu.memory_space<vmem>>, vector<1x16x32xf32>
    %150 = vector.shape_cast %149 : vector<1x16x32xf32> to vector<16x32xf32>
    %151 = vector.shape_cast %148 : vector<16x32xf32> to vector<1x16x32xf32>
    tpu.vector_store %arg9[%c0_76, %c0_77, %c0_78], %151 {strides = array<i32>} : memref<1x16x32xf32, #tpu.memory_space<vmem>>, vector<1x16x32xf32>,
    return
  }
  func.func @transform_0(%arg0: i32, %arg1: i32) -> (i32, i32, i32) {
    %c0_i32 = arith.constant 0 : i32
    %c0_i32_0 = arith.constant 0 : i32
    %c0_i32_1 = arith.constant 0 : i32
    return %arg0, %c0_i32, %c0_i32_0 : i32, i32, i32
  }
  func.func @transform_1(%arg0: i32, %arg1: i32) -> (i32, i32, i32) {
    %c0_i32 = arith.constant 0 : i32
    %c0_i32_0 = arith.constant 0 : i32
    %c0_i32_1 = arith.constant 0 : i32
    return %arg1, %c0_i32, %c0_i32_0 : i32, i32, i32
  }
  func.func @transform_2(%arg0: i32, %arg1: i32) -> (i32, i32, i32) {
    %c0_i32 = arith.constant 0 : i32
    %c0_i32_0 = arith.constant 0 : i32
    %c0_i32_1 = arith.constant 0 : i32
    return %arg1, %c0_i32, %c0_i32_0 : i32, i32, i32
  }
  func.func @transform_3(%arg0: i32, %arg1: i32) -> (i32, i32, i32) {
    %c0_i32 = arith.constant 0 : i32
    %c0_i32_0 = arith.constant 0 : i32
    %c0_i32_1 = arith.constant 0 : i32
    return %arg1, %c0_i32, %c0_i32_0 : i32, i32, i32
  }
  func.func @transform_4(%arg0: i32, %arg1: i32) -> (i32, i32) {
    %c0_i32 = arith.constant 0 : i32
    %c0_i32_0 = arith.constant 0 : i32
    %c0_i32_1 = arith.constant 0 : i32
    return %c0_i32, %c0_i32_0 : i32, i32
  }
  func.func @transform_5(%arg0: i32, %arg1: i32) -> (i32, i32) {
    %c0_i32 = arith.constant 0 : i32
    %c0_i32_0 = arith.constant 0 : i32
    %c0_i32_1 = arith.constant 0 : i32
    return %c0_i32, %c0_i32_0 : i32, i32
  }
  func.func @transform_6(%arg0: i32, %arg1: i32) -> (i32, i32) {
    %c0_i32 = arith.constant 0 : i32
    %c0_i32_0 = arith.constant 0 : i32
    %c0_i32_1 = arith.constant 0 : i32
    return %c0_i32, %c0_i32_0 : i32, i32
  }
  func.func @transform_7(%arg0: i32, %arg1: i32) -> (i32, i32, i32) {
    %c0_i32 = arith.constant 0 : i32
    %c0_i32_0 = arith.constant 0 : i32
    return %arg0, %c0_i32, %arg1 : i32, i32, i32
  }
}

</mosaic_0001>

<bundles_post_ra>
// kernel: tpu_custom_call.1
= control target key start
LH: loop header
LB: loop body
LE: loop exit
PB: predicated region body
PF: predicated region fallthrough
CT: control target
= control target key end

     0   :  { %12 = vsyncpa [#allocation3], 0  ;;  %s4088_s0 = inlined_call_operand.vmem [shape: f32[2,16,8], index: 0, kind: input, shape index: {}]   ;;  %s4089_s1 = inlined_call_operand.vmem [shape: f32[2,8,8], index: 1, kind: input, shape index: {}]   ;;  %s4090_s2 = inlined_call_operand.vmem [shape: f32[2,8,8], index: 2, kind: input, shape index: {}]   ;;  %s4091_s3 = inlined_call_operand.vmem [shape: f32[2,8,16], index: 3, kind: input, shape index: {}]   ;;  %s4092_s4 = inlined_call_operand.vmem [shape: f32[128,8], index: 4, kind: input, shape index: {}]   ;;  %s4093_s5 = inlined_call_operand.vmem [shape: f32[128,8], index: 5, kind: input, shape index: {}]   ;;  %s4094_s6 = inlined_call_operand.vmem [shape: f32[128,16], index: 6, kind: input, shape index: {}]   ;;  %s4095_s7 = inlined_call_operand.hbm [shape: f32[2,16,32], index: 7, kind: output, shape index: {}]  }
   0x1   :  { %14 = vsyncpa [#allocation3 + $0x1], 0  ;;  %s3204_s24 = smov 0   ;;  %s3206_s25 = smov 0  }
   0x2   :  { %s3208_s26 = smov 0   ;;  %s3210_s27 = smov 0  }
   0x3   :  { %s3212_s28 = smov 0   ;;  %s3214_s29 = smov 0  }
   0x4 LB: > { %s2283_s30 = sadd.s32 4294967295, %s3151_s29   ;;  %s2284_s8 = sadd.s32 4294967294, %s3151_s29   ;;  %s3151_s29 = sphi %s3214_s29, %s20_s29   ;;  %s3147_s28 = sphi %s3212_s28, %s4124_s28   ;;  %s3143_s27 = sphi %s3210_s27, %s4123_s27   ;;  %s3139_s26 = sphi %s3208_s26, %s4122_s26   ;;  %s3135_s25 = sphi %s3206_s25, %s4121_s25   ;;  %s3131_s24 = sphi %s3204_s24, %s4120_s24  }
   0x5   : > { %s32_s9 = sadd.s32 1, %s3147_s28  ;;  %s208_s10 = sadd.s32 1, %s3139_s26 }
   0x6   : > { %p34_p0 = scmp.ge.s32.totalorder %s32_s9, 2  ;;  %p218_p1 = scmp.ne.s32.totalorder %s3139_s26, %s3135_s25 }
   0x7   : > { %p219_p2 = scmp.eq.s32.totalorder %s2283_s30, 1  ;;  %p224_p3 = scmp.ne.s32.totalorder %s3135_s25, %s3131_s24 }
   0x8   : > { %s4126_s9 = smov (%p34_p0, %s32_s9), 0  ;;  %p225_p5 = scmp.eq.s32.totalorder %s2284_s8, 1 }
   0x9   : > { %p3244_p4 = por %p219_p2, %p218_p1  ;;  %s203_s12 = ssub.s32 %s3147_s28, %s4126_s9 }
   0xa   : > { %p2290_p6 = scmp.ge.s32.totalorder %s3151_s29, 1  ;;  %p206_p7 = scmp.eq.s32.totalorder %s203_s12, 0 }
   0xb   : > { %p3251_p8 = por %p225_p5, %p224_p3  ;;  %p287_p9 = scmp.lt.s32.totalorder %s3151_s29, 3 }
   0xc   : > { %s3257_s14 = scalar_select %p206_p7, %s3139_s26, %s208_s10  }
   0xd   : > { %p288_p10 = pnand %p2290_p6, %p287_p9 }
   0xe   : > { %v436_v0 = vld [vmem:[%s4089_s1] sm:$0xff] (!%p288_p10)  ;;  %p334_p11 = scmp.lt.s32.totalorder (!%p288_p10), %s3143_s27, 1  ;;  %vm437_vm0 = vcmask (!%p288_p10), 64512   ;;  %v360_v3 = vld [vmem:[%s4092_s4 + $0x8] sm:$0xff] (!%p288_p10)  ;;  %v361_v6 = vld [vmem:[%s4092_s4 + $0x10] sm:$0xff] (!%p288_p10)  ;;  %s3153_s8 = smov (!%p288_p10), 1   ;;  %v407_v55 = vlaneseq (!%p288_p10) }
   0xf   : > { %291 = sbr.rel (%p288_p10) target bundleno = 3734 (0xe96), region = 48  ;;  %v519_v1 = vld [vmem:[%s4090_s2] sm:$0xff] (!%p288_p10)  ;;  %2542 = vmatprep.subr.mxu0 (!%p288_p10), %v436_v0  ;;  %vm3274_vm1 = vmpackc.low (!%p288_p10), %vm437_vm0, %vm437_vm0  ;;  %v362_v7 = vld [vmem:[%s4092_s4 + $0x18] sm:$0xff] (!%p288_p10)  ;;  %s3154_s10 = smov (!%p288_p10), 2   ;;  %vm1134_vm15 = vcmask (!%p288_p10), 130048  }
  0x10   : > { %v359_v2 = vld [vmem:[%s4092_s4] sm:$0xff] (!%p288_p10)  ;;  %2547 = vmatprep.subr.mxu1 (!%p288_p10), %v519_v1  ;;  %2543 = vmatpush3.msra.mxu0 (!%p288_p10), %v436_v0  ;;  %v2802_v10 = vpack.c.bf16 (!%p288_p10), %v362_v7, %v361_v6  ;;  %v364_v12 = vld [vmem:[%s4092_s4 + $0x28] sm:$0xff] (!%p288_p10)  ;;  %v365_v14 = vld [vmem:[%s4092_s4 + $0x30] sm:$0xff] (!%p288_p10)  ;;  %v3543_v56 = vshrl.u32 (!%p288_p10), %v407_v55, 7  ;;  %s3156_s16 = smov (!%p288_p10), 8   ;;  %s3157_s17 = smov (!%p288_p10), 127  }
  0x11   : > { %2548 = vmatpush3.msra.mxu1 (!%p288_p10), %v519_v1  ;;  %v3279_v5 = vpack.c.bf16 (!%p288_p10), %v360_v3, %v359_v2  ;;  %v363_v11 = vld [vmem:[%s4092_s4 + $0x20] sm:$0xff] (!%p288_p10)  ;;  %v366_v15 = vld [vmem:[%s4092_s4 + $0x38] sm:$0xff] (!%p288_p10)  ;;  %v368_v18 = vld [vmem:[%s4092_s4 + $0x48] sm:$0xff] (!%p288_p10)  ;;  %s3159_s19 = smov (!%p288_p10), 124   ;;  %s3160_s20 = smov (!%p288_p10), 120  }
  0x12   : > { %v2808_v13 = vpack.c.bf16 (!%p288_p10), %v364_v12, %v363_v11  ;;  %v2814_v16 = vpack.c.bf16 (!%p288_p10), %v366_v15, %v365_v14  ;;  %v367_v17 = vld [vmem:[%s4092_s4 + $0x40] sm:$0xff] (!%p288_p10)  ;;  %v369_v20 = vld [vmem:[%s4092_s4 + $0x50] sm:$0xff] (!%p288_p10)  ;;  %v370_v21 = vld [vmem:[%s4092_s4 + $0x58] sm:$0xff] (!%p288_p10)  ;;  %v3546_v57 = vadd.s32 (!%p288_p10), 8, %v3543_v56  ;;  %v410_v1 = vand.u32 (!%p288_p10), 1, %v3543_v56  ;;  %s3162_s12 = smov (!%p288_p10), [#allocation2]  }
  0x13   : > { %2798 = vmatprep.subr.msk.bf16.mxu1 (!%p288_p10), %vm3274_vm1, %v3279_v5  ;;  %v2820_v19 = vpack.c.bf16 (!%p288_p10), %v368_v18, %v367_v17  ;;  %v2826_v22 = vpack.c.bf16 (!%p288_p10), %v370_v21, %v369_v20  ;;  %v371_v23 = vld [vmem:[%s4092_s4 + $0x60] sm:$0xff] (!%p288_p10)  ;;  %v372_v24 = vld [vmem:[%s4092_s4 + $0x68] sm:$0xff] (!%p288_p10)  ;;  %v373_v26 = vld [vmem:[%s4092_s4 + $0x70] sm:$0xff] (!%p288_p10)  ;;  %v3576_v18 = vand.u32 (!%p288_p10), 127, %v407_v55  ;;  %vm1019_vm4 = vcmp.lt.s32.totalorder (!%p288_p10), %v3543_v56, 1  ;;  %s3077_s21 = sshll.u32 (!%p288_p10), %s3162_s12, 4  ;;  %s3078_s21 = int_to_ptr.vmem [resolvable:$false] %s3077_s21 }
  0x14   : > { %v2832_v25 = vpack.c.bf16 (!%p288_p10), %v372_v24, %v371_v23  ;;  %v374_v27 = vld [vmem:[%s4092_s4 + $0x78] sm:$0xff] (!%p288_p10)  ;;  %v595_v29 = vld [vmem:[%s4091_s3] sm:$0xff] (!%p288_p10)  ;;  %v3433_v36 = vld [vmem:[%s4093_s5 + $0x8] sm:$0xff] (!%p288_p10)  ;;  %v411_v58 = vand.u32 (!%p288_p10), 1, %v3546_v57  ;;  %vm3566_vm3 = vcmp.ne.s32.totalorder (!%p288_p10), %v410_v1, 0  ;;  %vm1035_vm6 = vcmp.lt.s32.totalorder (!%p288_p10), %v3543_v56, 2 }
  0x15   : > { %v2838_v28 = vpack.c.bf16 (!%p288_p10), %v374_v27, %v373_v26  ;;  %2552 = vmatprep.subr.mxu0 (!%p288_p10), %v595_v29  ;;  %v3428_v35 = vld [vmem:[%s4093_s5] sm:$0xff] (!%p288_p10)  ;;  %v3438_v37 = vld [vmem:[%s4093_s5 + $0x10] sm:$0xff] (!%p288_p10)  ;;  %v3449_v38 = vld [vmem:[%s4093_s5 + $0x18] sm:$0xff] (!%p288_p10)  ;;  %v428_v21 = vand.u32 (!%p288_p10), 1, %v3576_v18  ;;  %vm1048_vm8 = vcmp.lt.s32.totalorder (!%p288_p10), %v3543_v56, 4 }
  0x16   : > { %s335_s23 = scalar_select %p334_p11, %s3143_s27, 1  ;;  %v3454_v39 = vld [vmem:[%s4093_s5 + $0x20] sm:$0xff]  ;;  %v3463_v40 = vld [vmem:[%s4093_s5 + $0x28] sm:$0xff]  ;;  %v3468_v41 = vld [vmem:[%s4093_s5 + $0x30] sm:$0xff]  ;;  %vm3555_vm2 = vcmp.ne.s32.totalorder %v411_v58, 0 }
  0x17   : > { %v3477_v42 = vld [vmem:[%s4093_s5 + $0x38] sm:$0xff]  ;;  %v3484_v43 = vld [vmem:[%s4093_s5 + $0x40] sm:$0xff]  ;;  %v3491_v44 = vld [vmem:[%s4093_s5 + $0x48] sm:$0xff]  ;;  %vm3580_vm5 = vcmp.ne.s32.totalorder %v428_v21, 0 }
  0x18   : > { %s2398_s15 = sshll.u32 %s335_s23, 4  ;;  %v3498_v45 = vld [vmem:[%s4093_s5 + $0x50] sm:$0xff]  ;;  %v3505_v46 = vld [vmem:[%s4093_s5 + $0x58] sm:$0xff]  ;;  %v3512_v47 = vld [vmem:[%s4093_s5 + $0x60] sm:$0xff] }
  0x19   : > { %s338_s18 = scalar_lea.vmem %s4088_s0, %s2398_s15  ;;  %v3519_v48 = vld [vmem:[%s4093_s5 + $0x68] sm:$0xff]  ;;  %v3524_v49 = vld [vmem:[%s4093_s5 + $0x70] sm:$0xff]  ;;  %v3533_v50 = vld [vmem:[%s4093_s5 + $0x78] sm:$0xff]  ;;  %s3155_s15 = smov 4  }
  0x1a   : > { %v3293_v8 = vld [vmem:[%s338_s18] sm:$0xff]  ;;  %v3295_v9 = vld [vmem:[%s338_s18 + $0x8] sm:$0xff]  ;;  %s3158_s18 = smov 126  }
  0x1b   : > { %2544 = vmatprep.mubr.msk.f32.mxu0 %vm437_vm0, %v3293_v8  ;;  %2549 = vmatprep.mubr.msk.f32.mxu1 %vm437_vm0, %v3293_v8 }
  0x1c   : > { %2545 = vmatmul.mubr.msk.f32.vlgmr.msra.gmra.mrb[0].mxu0 %vm437_vm0, %v3295_v9  ;;  %2550 = vmatmul.mubr.msk.f32.vlgmr.msra.gmra.mrb[0].mxu1 %vm437_vm0, %v3295_v9 }
  0x1d   : > { %2801 = vmatpush3.bf16.xpose.msk.msra.mxu1 %vm3274_vm1, %v3279_v5  ;;  %2554 = vmatprep.mubr.msk.f32.mxu0 %vm437_vm0, %v3293_v8 }
  0x1e   : > { %2804 = vmatprep.subr.msk.bf16.mxu1 %vm3274_vm1, %v2802_v10  ;;  %2553 = vmatpush3.msra.mxu0 %v595_v29 }
  0x20   : > { %2555 = vmatmul.mubr.msk.f32.vlgmr.msra.gmra.mrb[2].mxu0 %vm437_vm0, %v3295_v9 }
  0x21   : > { %2596 = vmatprep.mubr.msk.f32.mxu0 %vm437_vm0, %v3428_v35 }
  0x25   : > { %2807 = vmatpush3.bf16.xpose.msk.msra.mxu1 %vm3274_vm1, %v2802_v10 }
  0x26   : > { %2810 = vmatprep.subr.msk.bf16.mxu1 %vm3274_vm1, %v2808_v13 }
  0x2d   : > { %2813 = vmatpush3.bf16.xpose.msk.msra.mxu1 %vm3274_vm1, %v2808_v13 }
  0x2e   : > { %2816 = vmatprep.subr.msk.bf16.mxu1 %vm3274_vm1, %v2814_v16 }
  0x35   : > { %2819 = vmatpush3.bf16.xpose.msk.msra.mxu1 %vm3274_vm1, %v2814_v16 }
  0x36   : > { %2822 = vmatprep.subr.msk.bf16.mxu1 %vm3274_vm1, %v2820_v19 }
  0x3d   : > { %2825 = vmatpush3.bf16.xpose.msk.msra.mxu1 %vm3274_vm1, %v2820_v19 }
  0x3e   : > { %2828 = vmatprep.subr.msk.bf16.mxu1 %vm3274_vm1, %v2826_v22 }
  0x45   : > { %2831 = vmatpush3.bf16.xpose.msk.msra.mxu1 %vm3274_vm1, %v2826_v22 }
  0x46   : > { %2834 = vmatprep.subr.msk.bf16.mxu1 %vm3274_vm1, %v2832_v25 }
  0x4d   : > { %2837 = vmatpush3.bf16.xpose.msk.msra.mxu1 %vm3274_vm1, %v2832_v25 }
  0x4e   : > { %2840 = vmatprep.subr.msk.bf16.mxu1 %vm3274_vm1, %v2838_v28 }
  0x55   : > { %2843 = vmatpush3.bf16.xpose.msk.msra.mxu1 %vm3274_vm1, %v2838_v28 }
  0xef   : > { %v2546_v30 = vpop.f32.mrb[0].mxu0  ;;  %v2551_v31 = vpop.f32.mrb[0].mxu1 }
  0xf0   : > { %v510_v32 = vpop.f32.mrb[1].mxu0  ;;  %v586_v33 = vpop.f32.mrb[1].mxu1 }
  0xf1   : > { %v2844_v34 = vpack.c.bf16 %v2551_v31, %v586_v33  ;;  %2589 = vmatprep.mubr.msk.f32.mxu1 %vm437_vm0, %v510_v32  ;;  %v430_v33 = vand.u32 2, %v3576_v18 }
  0xf2   : > { %2590 = vmatmul.mubr.msk.f32.vlgmr.msra.gmra.mrb[2].mxu1 %vm437_vm0, %v2546_v30 }
  0xf3   : > { %2852 = vmatprep.subr.msk.bf16.mxu1 %vm3274_vm1, %v2844_v34  ;;  %2624 = vmatprep.mubr.msk.f32.mxu1 %vm437_vm0, %v510_v32  ;;  %v2556_v59 = vpop.f32.mrb[2].mxu0  ;;  %vm3609_vm7 = vcmp.ne.s32.totalorder %v430_v33, 0  ;;  %v391_v33 = vld [vmem:[%s4094_s6] sm:$0xff] }
  0xf4   : > { %2855 = vmatpush3.bf16.xpose.msk.msra.mxu1 %vm3274_vm1, %v2844_v34  ;;  %2846 = vmatprep.subr.msk.bf16.mxu0 %vm3274_vm1, %v2844_v34  ;;  %v662_v60 = vpop.f32.mrb[3].mxu0 }
  0xf5   : > { %2849 = vmatpush3.bf16.xpose.msk.msra.mxu0 %vm3274_vm1, %v2844_v34  ;;  %2894 = vmatprep.subr.msk.bf16.mxu1 %vm3274_vm1, %v3279_v5  ;;  %v3549_v61 = vpack.c.bf16 %v2556_v59, %v662_v60 }
  0xfb   : > { %2625 = vmatmul.mubr.msk.f32.vlgmr.msra.gmra.mrb[4].mxu1 %vm437_vm0, %v2546_v30 }
  0xfc   : > { %2897 = vmatpush3.bf16.xpose.msk.msra.mxu1 %vm3274_vm1, %v3279_v5  ;;  %2597 = vmatmul.mubr.msk.f32.vlgmr.msra.gmra.mrb[4].mxu0 %vm437_vm0, %v3433_v36 }
  0xfd   : > { %2900 = vmatprep.subr.msk.bf16.mxu1 %vm3274_vm1, %v2802_v10  ;;  %2599 = vmatprep.mubr.msk.f32.mxu0 %vm437_vm0, %v3438_v37 }
 0x100   : > { %2600 = vmatmul.mubr.msk.f32.gmra.mrb[6].mxu0 %vm437_vm0, %v3449_v38 }
 0x101   : > { %2602 = vmatprep.mubr.msk.f32.mxu0 %vm437_vm0, %v3454_v39 }
 0x104   : > { %2903 = vmatpush3.bf16.xpose.msk.msra.mxu1 %vm3274_vm1, %v2802_v10  ;;  %2603 = vmatmul.mubr.msk.f32.gmra.mrb[8].mxu0 %vm437_vm0, %v3463_v40 }
 0x105   : > { %2906 = vmatprep.subr.msk.bf16.mxu1 %vm3274_vm1, %v2808_v13  ;;  %2605 = vmatprep.mubr.msk.f32.mxu0 %vm437_vm0, %v3468_v41 }
 0x108   : > { %2606 = vmatmul.mubr.msk.f32.gmra.mrb[10].mxu0 %vm437_vm0, %v3477_v42 }
 0x109   : > { %2608 = vmatprep.mubr.msk.f32.mxu0 %vm437_vm0, %v3484_v43 }
 0x10c   : > { %2909 = vmatpush3.bf16.xpose.msk.msra.mxu1 %vm3274_vm1, %v2808_v13  ;;  %2609 = vmatmul.mubr.msk.f32.gmra.mrb[12].mxu0 %vm437_vm0, %v3491_v44 }
 0x10d   : > { %2912 = vmatprep.subr.msk.bf16.mxu1 %vm3274_vm1, %v2814_v16  ;;  %2611 = vmatprep.mubr.msk.f32.mxu0 %vm437_vm0, %v3498_v45 }
 0x110   : > { %2612 = vmatmul.mubr.msk.f32.gmra.mrb[14].mxu0 %vm437_vm0, %v3505_v46 }
 0x111   : > { %2614 = vmatprep.mubr.msk.f32.mxu0 %vm437_vm0, %v3512_v47 }
 0x114   : > { %2915 = vmatpush3.bf16.xpose.msk.msra.mxu1 %vm3274_vm1, %v2814_v16  ;;  %2615 = vmatmul.mubr.msk.f32.gmra.mrb[16].mxu0 %vm437_vm0, %v3519_v48 }
 0x115   : > { %2918 = vmatprep.subr.msk.bf16.mxu1 %vm3274_vm1, %v2820_v19  ;;  %2617 = vmatprep.mubr.msk.f32.mxu0 %vm437_vm0, %v3524_v49 }
 0x118   : > { %2618 = vmatmul.mubr.msk.f32.gmra.mrb[18].mxu0 %vm437_vm0, %v3533_v50 }
 0x11c   : > { %2921 = vmatpush3.bf16.xpose.msk.msra.mxu1 %vm3274_vm1, %v2820_v19 }
 0x11d   : > { %2924 = vmatprep.subr.msk.bf16.mxu1 %vm3274_vm1, %v2826_v22 }
 0x124   : > { %2927 = vmatpush3.bf16.xpose.msk.msra.mxu1 %vm3274_vm1, %v2826_v22 }
 0x125   : > { %2930 = vmatprep.subr.msk.bf16.mxu1 %vm3274_vm1, %v2832_v25 }
 0x12c   : > { %2933 = vmatpush3.bf16.xpose.msk.msra.mxu1 %vm3274_vm1, %v2832_v25 }
 0x12d   : > { %2936 = vmatprep.subr.msk.bf16.mxu1 %vm3274_vm1, %v2838_v28 }
 0x134   : > { %2939 = vmatpush3.bf16.xpose.msk.msra.mxu1 %vm3274_vm1, %v2838_v28 }
 0x1c5   : > { %v2591_v51 = vpop.f32.mrb[2].mxu1 }
 0x1c6   : > { %802 = vrot.lane.b32.xlu0 %v2591_v51, %s3153_s8  ;;  %v791_v52 = vpop.f32.mrb[3].mxu1 }
 0x1c7   : > { %800 = vrot.lane.b32.xlu1 %v791_v52, %s3153_s8 }
 0x1ce   : > { %v3539_v53 = vpop.f32.mrb[4].mxu1 }
 0x1cf   : > { %v3541_v54 = vpop.f32.mrb[5].mxu1  ;;  %v3551_v62 = vpop.f32.mrb[4].mxu0 }
 0x1d0   : > { %v3553_v63 = vpop.f32.mrb[5].mxu0 }
 0x1d1   : > { %v1013_v27 = vrot.slane %v3553_v63, 7 }
 0x1d3   : > { %v2601_v2 = vpop.f32.mrb[6].mxu0 }
 0x1d4   : > { %v954_v3 = vpop.f32.mrb[7].mxu0 }
 0x1d7   : > { %v2604_v6 = vpop.f32.mrb[8].mxu0 }
 0x1d8   : > { %v962_v10 = vpop.f32.mrb[9].mxu0 }
 0x1db   : > { %v2607_v13 = vpop.f32.mrb[10].mxu0 }
 0x1dc   : > { %v970_v14 = vpop.f32.mrb[11].mxu0 }
 0x1df   : > { %v2610_v16 = vpop.f32.mrb[12].mxu0 }
 0x1e0   : > { %v978_v17 = vpop.f32.mrb[13].mxu0 }
 0x1e3   : > { %v2613_v19 = vpop.f32.mrb[14].mxu0 }
 0x1e4   : > { %v986_v20 = vpop.f32.mrb[15].mxu0 }
 0x1e5   : > { %v432_v20 = vand.u32 4, %v3576_v18 }
 0x1e7   : > { %v2616_v22 = vpop.f32.mrb[16].mxu0  ;;  %vm3636_vm9 = vcmp.ne.s32.totalorder %v432_v20, 0 }
 0x1e8   : > { %v1016_v23 = vrot.slane %v2616_v22, 7  ;;  %v994_v24 = vpop.f32.mrb[17].mxu0 }
 0x1e9   : > { %v1015_v26 = vrot.slane %v994_v24, 7 }
 0x1eb   : > { %v1022_v28 = vsel %vm1019_vm4, %v1015_v26, %v1016_v23  ;;  %v2619_v29 = vpop.f32.mrb[18].mxu0 }
 0x1ec   : > { %v1027_v30 = vsel %vm3580_vm5, %v1022_v28, %v2616_v22  ;;  %v1018_v31 = vrot.slane %v2619_v29, 7  ;;  %v1004_v32 = vpop.f32.mrb[19].mxu0  ;;  %v415_v28 = vand.u32 2, %v3546_v57 }
 0x1ed   : > { %v1017_v34 = vrot.slane %v1004_v32, 7 }
 0x1ee   : > { %vm3658_vm10 = vcmp.ne.s32.totalorder %v415_v28, 0  ;;  %v401_v28 = vld [vmem:[%s4094_s6 + $0x50] sm:$0xff] }
 0x1ef   : > { %v1020_v58 = vsel %vm1019_vm4, %v1017_v34, %v1018_v31  ;;  %v1021_v59 = vsel %vm1019_vm4, %v1016_v23, %v1017_v34  ;;  %v392_v34 = vld [vmem:[%s4094_s6 + $0x8] sm:$0xff] }
 0x1f0   : > { %v1028_v1 = vsel %vm3580_vm5, %v1021_v59, %v1004_v32  ;;  %v1029_v2 = vsel %vm3580_vm5, %v1020_v58, %v2619_v29  ;;  %v414_v32 = vand.u32 2, %v3543_v56  ;;  %v3672_v58 = vpack.c.bf16 %v392_v34, %v391_v33  ;;  %v394_v59 = vld [vmem:[%s4094_s6 + $0x18] sm:$0xff]  ;;  %v403_v34 = vld [vmem:[%s4094_s6 + $0x60] sm:$0xff] }
 0x1f1   : > { %v1034_v6 = vrot.slane %v1029_v2, 6 }
 0x1f2   : > { %vm3689_vm11 = vcmp.ne.s32.totalorder %v414_v32, 0  ;;  %2857 = vmatprep.subr.bf16.mxu0 %v3672_v58  ;;  %v402_v32 = vld [vmem:[%s4094_s6 + $0x58] sm:$0xff] }
 0x1f3   : > { %2859 = vmatpush3.bf16.msra.mxu0 %v3672_v58  ;;  %v3730_v33 = vpack.c.bf16 %v402_v32, %v401_v28 }
 0x238   : > { %v803_v5 = vpop.permute.xlu0 %802 }
 0x239   : > { %v3562_v7 = vsel %vm3555_vm2, %v803_v5, %v2591_v51  ;;  %v801_v11 = vpop.permute.xlu1 %800  ;;  %v1024_v51 = vsel %vm1019_vm4, %v1018_v31, %v1013_v27  ;;  %v1033_v5 = vrot.slane %v1028_v1, 6 }
 0x23a   : > { %808 = vrot.lane.b32.xlu0 %v3562_v7, %s3154_s10  ;;  %v3572_v15 = vsel %vm3566_vm3, %v801_v11, %v791_v52  ;;  %v1032_v52 = vrot.slane %v1027_v30, 6  ;;  %v3597_v55 = vsel %vm3580_vm5, %v1024_v51, %v3553_v63  ;;  %v393_v51 = vld [vmem:[%s4094_s6 + $0x10] sm:$0xff] }
 0x23b   : > { %v1030_v60 = vrot.slane %v3597_v55, 6  ;;  %v1036_v10 = vsel %vm1035_vm6, %v1033_v5, %v1034_v6 }
 0x23c   : > { %v1037_v11 = vsel %vm1035_vm6, %v1032_v52, %v1033_v5  ;;  %v3630_v17 = vsel %vm3609_vm7, %v1036_v10, %v1029_v2  ;;  %v3680_v2 = vpack.c.bf16 %v394_v59, %v393_v51  ;;  %v395_v5 = vld [vmem:[%s4094_s6 + $0x20] sm:$0xff]  ;;  %v404_v51 = vld [vmem:[%s4094_s6 + $0x68] sm:$0xff]  ;;  %v405_v59 = vld [vmem:[%s4094_s6 + $0x70] sm:$0xff] }
 0x23d   : > { %v1039_v13 = vsel %vm1035_vm6, %v1034_v6, %v1030_v60  ;;  %v1042_v14 = vsel %vm3609_vm7, %v1037_v11, %v1028_v1  ;;  %v1047_v22 = vrot.slane %v3630_v17, 4  ;;  %v396_v6 = vld [vmem:[%s4094_s6 + $0x28] sm:$0xff] }
 0x23e   : > { %806 = vrot.lane.b32.xlu0 %v3572_v15, %s3154_s10  ;;  %v3626_v16 = vsel %vm3609_vm7, %v1039_v13, %v3597_v55  ;;  %v1046_v19 = vrot.slane %v1042_v14, 4  ;;  %2861 = vmatprep.subr.bf16.mxu0 %v3680_v2  ;;  %v3696_v11 = vpack.c.bf16 %v396_v6, %v395_v5  ;;  %v397_v14 = vld [vmem:[%s4094_s6 + $0x30] sm:$0xff]  ;;  %v406_v5 = vld [vmem:[%s4094_s6 + $0x78] sm:$0xff] }
 0x23f   : > { %v1044_v21 = vrot.slane %v3626_v16, 4  ;;  %2863 = vmatpush3.bf16.msra.mxu0 %v3680_v2  ;;  %v3750_v6 = vpack.c.bf16 %v406_v5, %v405_v59 }
 0x240   : > { %v3642_v24 = vsel %vm1048_vm8, %v1046_v19, %v1047_v22  ;;  %v398_v19 = vld [vmem:[%s4094_s6 + $0x38] sm:$0xff]  ;;  %2865 = vmatprep.subr.bf16.mxu0 %v3696_v11 }
 0x241   : > { %v1051_v26 = vsel %vm1048_vm8, %v1047_v22, %v1044_v21  ;;  %v1054_v30 = vsel %vm3636_vm9, %v3642_v24, %v3630_v17  ;;  %v3710_v20 = vpack.c.bf16 %v398_v19, %v397_v14  ;;  %v400_v22 = vld [vmem:[%s4094_s6 + $0x48] sm:$0xff]  ;;  %v418_v19 = vand.u32 4, %v3543_v56 }
 0x242   : > { %v3652_v29 = vsel %vm3636_vm9, %v1051_v26, %v3626_v16 }
 0x243   : > { %2867 = vmatpush3.bf16.msra.mxu0 %v3696_v11  ;;  %vm3766_vm13 = vcmp.ne.s32.totalorder %v418_v19, 0 }
 0x244   : > { %2869 = vmatprep.subr.bf16.mxu0 %v3710_v20 }
 0x247   : > { %2871 = vmatpush3.bf16.msra.mxu0 %v3710_v20 }
 0x2ac   : > { %v809_v52 = vpop.permute.xlu0 %808 }
 0x2ad   : > { %v811_v1 = vsel %vm3658_vm10, %v809_v52, %v3562_v7  ;;  %v3740_v52 = vpack.c.bf16 %v404_v51, %v403_v34 }
 0x2ae   : > { %814 = vrot.lane.b32.xlu1 %v811_v1, %s3155_s15 }
 0x2b0   : > { %v807_v7 = vpop.permute.xlu0 %806 }
 0x2b1   : > { %v810_v13 = vsel %vm3689_vm11, %v807_v7, %v3572_v15  ;;  %v399_v15 = vld [vmem:[%s4094_s6 + $0x40] sm:$0xff]  ;;  %v419_v7 = vand.u32 4, %v3546_v57 }
 0x2b2   : > { %812 = vrot.lane.b32.xlu0 %v810_v13, %s3155_s15  ;;  %v3720_v26 = vpack.c.bf16 %v400_v22, %v399_v15  ;;  %v434_v15 = vand.u32 8, %v3576_v18 }
 0x2b3   : > { %vm3757_vm12 = vcmp.ne.s32.totalorder %v419_v7, 0  ;;  %v1014_v7 = vrot.slane %v3551_v62, 7 }
 0x2b4   : > { %2873 = vmatprep.subr.bf16.mxu0 %v3720_v26  ;;  %vm3770_vm14 = vcmp.ne.s32.totalorder %v434_v15, 0 }
 0x2b5   : > { %2875 = vmatpush3.bf16.msra.mxu0 %v3720_v26  ;;  %v1055_v18 = vsel %vm3770_vm14, %v1054_v30, %v3652_v29 }
 0x2b6   : > { %2877 = vmatprep.subr.bf16.mxu0 %v3730_v33 }
 0x2b9   : > { %2879 = vmatpush3.bf16.msra.mxu0 %v3730_v33 }
 0x2ba   : > { %2881 = vmatprep.subr.bf16.mxu0 %v3740_v52 }
 0x2bd   : > { %2883 = vmatpush3.bf16.msra.mxu0 %v3740_v52 }
 0x2be   : > { %2885 = vmatprep.subr.bf16.mxu0 %v3750_v6 }
 0x2c1   : > { %2887 = vmatpush3.bf16.msra.mxu0 %v3750_v6 }
 0x2c2   : > { %2889 = vmatprep.subr.bf16.mxu0 %v3549_v61 }
 0x320   : > { %v815_v22 = vpop.permute.xlu1 %814 }
 0x321   : > { %v817_v28 = vsel %vm3757_vm12, %v815_v22, %v811_v1 }
 0x322   : > { %820 = vrot.lane.b32.xlu1 %v817_v28, %s3156_s16 }
 0x324   : > { %v813_v34 = vpop.permute.xlu0 %812 }
 0x325   : > { %v816_v51 = vsel %vm3766_vm13, %v813_v34, %v810_v13  ;;  %v1023_v13 = vsel %vm1019_vm4, %v1013_v27, %v1014_v7 }
 0x326   : > { %v1124_v1 = vadd.f32 %v3541_v54, %v816_v51  ;;  %v1026_v17 = vsel %vm3580_vm5, %v1023_v13, %v3551_v62 }
 0x327   : > { %v1031_v24 = vrot.slane %v1026_v17, 6 }
 0x328   : > { %v1132_v59 = vadd.f32 %v1124_v1, %v1055_v18 }
 0x329   : > { %v1038_v54 = vsel %vm1035_vm6, %v1030_v60, %v1031_v24 }
 0x32a   : > { %v1135_v5 = vsel %vm1134_vm15, %v1132_v59, -inf  ;;  %v1041_v30 = vsel %vm3609_vm7, %v1038_v54, %v1026_v17 }
 0x32b   : > { %1136 = vmax.xlane.f32.xlu0 %v1135_v5  ;;  %v1045_v19 = vrot.slane %v1041_v30, 4 }
 0x32d   : > { %v1050_v63 = vsel %vm1048_vm8, %v1044_v21, %v1045_v19 }
 0x32e   : > { %v1053_v27 = vsel %vm3636_vm9, %v1050_v63, %v1041_v30 }
 0x32f   : > { %v1056_v55 = vsel %vm3770_vm14, %v3652_v29, %v1053_v27 }
 0x394   : > { %v821_v15 = vpop.permute.xlu1 %820 }
 0x395   : > { %v1129_v62 = vadd.f32 %v3539_v53, %v821_v15 }
 0x397   : > { %v1133_v60 = vadd.f32 %v1129_v62, %v1056_v55 }
 0x399   : > { %v1138_v22 = vsel %vm1134_vm15, %v1133_v60, -inf }
 0x39a   : > { %1139 = vmax.xlane.f32.xlu1 %v1138_v22 }
 0x3b8   : > { %v1137_v28 = vpop.xlane.xlu0 %1136 }
 0x3b9   : > { %v1141_v34 = vsub.f32 %v1132_v59, %v1137_v28 }
 0x3bb   : > { %v1143_v16 = vmul.f32 1.442695, %v1141_v34 }
 0x3bd   : > { %3057 = vpow2.f32 %v1143_v16 }
 0x3c7   : > { %v3058_v51 = vpop.eup %3057 }
 0x3c8   : > { %v1147_v21 = vsel %vm1134_vm15, %v3058_v51, 0.0 }
 0x3c9   : > { %1148 = vadd.xlane.f32.xlu1 %v1147_v21 }
 0x427   : > { %v1140_v18 = vpop.xlane.xlu1 %1139 }
 0x428   : > { %v1142_v1 = vsub.f32 %v1133_v60, %v1140_v18 }
 0x42a   : > { %v1145_v5 = vmul.f32 1.442695, %v1142_v1  ;;  %v2342_v1 = vld [vmem:[%s4089_s1 + $0x8] sm:$0xff] }
 0x42c   : > { %3059 = vpow2.f32 %v1145_v5  ;;  %v2345_v5 = vld [vmem:[%s4090_s2 + $0x8] sm:$0xff] }
 0x436   : > { %v3060_v53 = vpop.eup %3059 }
 0x437   : > { %v1150_v7 = vsel %vm1134_vm15, %v3060_v53, 0.0 }
 0x438   : > { %1151 = vadd.xlane.f32.xlu0 %v1150_v7 }
 0x456   : > { %v1149_v29 = vpop.xlane.xlu1 %1148 }
 0x457   : > { %3061 = vrcp.f32 %v1149_v29 }
 0x461   : > { %v3062_v13 = vpop.eup %3061 }
 0x462   : > { %v1155_v17 = vmul.f32 %v3062_v13, %v3058_v51 }
 0x464   : > { %v1157_v59 = vsel %vm1134_vm15, %v1155_v17, 0.0 }
 0x465   : > { %1159 = vrot.lane.b32.xlu1 %v1157_v59, %s3157_s17 }
 0x4c5   : > { %v1152_v24 = vpop.xlane.xlu0 %1151 }
 0x4c6   : > { %3063 = vrcp.f32 %v1152_v24 }
 0x4d0   : > { %v3064_v54 = vpop.eup %3063 }
 0x4d1   : > { %v1156_v30 = vmul.f32 %v3064_v54, %v3060_v53 }
 0x4d3   : > { %v1158_v19 = vsel %vm1134_vm15, %v1156_v30, 0.0 }
 0x4d4   : > { %1161 = vrot.lane.b32.xlu0 %v1158_v19, %s3157_s17 }
 0x4d7   : > { %v1160_v63 = vpop.permute.xlu1 %1159 }
 0x4d8   : > { %v1163_v27 = vsel %vm3566_vm3, %v1160_v63, %v1157_v59 }
 0x4d9   : > { %1165 = vrot.lane.b32.xlu0 %v1163_v27, %s3158_s18 }
 0x546   : > { %v1162_v15 = vpop.permute.xlu0 %1161 }
 0x547   : > { %v1164_v62 = vsel %vm3555_vm2, %v1162_v15, %v1158_v19 }
 0x548   : > { %1167 = vrot.lane.b32.xlu1 %v1164_v62, %s3158_s18 }
 0x54b   : > { %v1166_v55 = vpop.permute.xlu0 %1165 }
 0x54c   : > { %v1169_v60 = vsel %vm3689_vm11, %v1166_v55, %v1163_v27 }
 0x54d   : > { %1171 = vrot.lane.b32.xlu0 %v1169_v60, %s3159_s19 }
 0x5ba   : > { %v1168_v22 = vpop.permute.xlu1 %1167 }
 0x5bb   : > { %v1170_v28 = vsel %vm3658_vm10, %v1168_v22, %v1164_v62 }
 0x5bc   : > { %1173 = vrot.lane.b32.xlu1 %v1170_v28, %s3159_s19 }
 0x5bf   : > { %v1172_v34 = vpop.permute.xlu0 %1171 }
 0x5c0   : > { %v1175_v16 = vsel %vm3766_vm13, %v1172_v34, %v1169_v60 }
 0x5c1   : > { %2659 = vmatprep.mubr.f32.mxu0 %v1175_v16 }
 0x62e   : > { %v1174_v51 = vpop.permute.xlu1 %1173 }
 0x62f   : > { %v1176_v21 = vsel %vm3757_vm12, %v1174_v51, %v1170_v28 }
 0x630   : > { %1179 = vrot.lane.b32.xlu1 %v1176_v21, %s3160_s20 }
 0x6a2   : > { %v1180_v18 = vpop.permute.xlu1 %1179 }
 0x6a3   : > { %2660 = vmatmul.mubr.f32.vlgmr.msra.gmra.mrb[20].mxu0 %v1180_v18 }
 0x6a4   : > { %2891 = vmatpush3.bf16.msra.mxu0 %v3549_v61  ;;  %2666 = vmatprep.mubr.msk.f32.mxu0 %vm1134_vm15, %v1155_v17  ;;  %v2348_v61 = vld [vmem:[%s4091_s3 + $0x8] sm:$0xff] }
 0x6a5   : > { %2669 = vmatprep.subr.mxu0 %v2342_v1 }
 0x6ab   : > { %2667 = vmatmul.mubr.msk.f32.vlgmr.msra.gmra.mrb[20].mxu0 %vm1134_vm15, %v1156_v30 }
 0x6ac   : > { %2670 = vmatpush3.msra.mxu0 %v2342_v1  ;;  %2671 = vmatprep.mubr.msk.f32.mxu0 %vm437_vm0, %v3293_v8 }
 0x6ad   : > { %2674 = vmatprep.subr.mxu0 %v2345_v5 }
 0x6af   : > { %2672 = vmatmul.mubr.msk.f32.vlgmr.msra.gmra.mrb[22].mxu0 %vm437_vm0, %v3295_v9 }
 0x6b0   : > { %2675 = vmatpush3.msra.mxu0 %v2345_v5  ;;  %2676 = vmatprep.mubr.msk.f32.mxu0 %vm437_vm0, %v3293_v8 }
 0x6b1   : > { %2679 = vmatprep.subr.mxu0 %v2348_v61 }
 0x6b3   : > { %2677 = vmatmul.mubr.msk.f32.vlgmr.msra.gmra.mrb[24].mxu0 %vm437_vm0, %v3295_v9 }
 0x6b4   : > { %2681 = vmatprep.mubr.msk.f32.mxu0 %vm437_vm0, %v3293_v8  ;;  %2680 = vmatpush3.msra.mxu0 %v2348_v61 }
 0x6b7   : > { %2682 = vmatmul.mubr.msk.f32.vlgmr.msra.gmra.mrb[26].mxu0 %vm437_vm0, %v3295_v9 }
 0x6b8   : > { %2723 = vmatprep.mubr.msk.f32.mxu0 %vm437_vm0, %v3428_v35 }
 0x77e   : > { %v3860_v53 = vpop.f32.mrb[20].mxu0 }
 0x77f   : > { %v3862_v7 = vpop.f32.mrb[21].mxu0 }
 0x782   : > { %v2673_v29 = vpop.f32.mrb[22].mxu0 }
 0x783   : > { %v1407_v13 = vpop.f32.mrb[23].mxu0 }
 0x784   : > { %2716 = vmatprep.mubr.msk.f32.mxu1 %vm437_vm0, %v1407_v13 }
 0x785   : > { %2717 = vmatmul.mubr.msk.f32.vlgmr.msra.gmra.mrb[6].mxu1 %vm437_vm0, %v2673_v29 }
 0x786   : > { %v2678_v8 = vpop.f32.mrb[24].mxu0 }
 0x787   : > { %v1484_v17 = vpop.f32.mrb[25].mxu0 }
 0x788   : > { %v2940_v59 = vpack.c.bf16 %v2678_v8, %v1484_v17 }
 0x78a   : > { %2942 = vmatprep.subr.msk.bf16.mxu0 %vm3274_vm1, %v2940_v59  ;;  %v2683_v4 = vpop.f32.mrb[26].mxu0 }
 0x78b   : > { %2945 = vmatpush3.bf16.xpose.msk.msra.mxu0 %vm3274_vm1, %v2940_v59  ;;  %v1561_v9 = vpop.f32.mrb[27].mxu0 }
 0x78c   : > { %2948 = vmatprep.subr.msk.bf16.mxu0 %vm3274_vm1, %v2940_v59  ;;  %v3922_v35 = vpack.c.bf16 %v2683_v4, %v1561_v9 }
 0x792   : > { %2724 = vmatmul.mubr.msk.f32.vlgmr.msra.gmra.mrb[28].mxu0 %vm437_vm0, %v3433_v36 }
 0x793   : > { %2726 = vmatprep.mubr.msk.f32.mxu0 %vm437_vm0, %v3438_v37  ;;  %2951 = vmatpush3.bf16.xpose.msk.msra.mxu0 %vm3274_vm1, %v2940_v59 }
 0x794   : > { %2953 = vmatprep.subr.bf16.mxu0 %v3672_v58 }
 0x796   : > { %2727 = vmatmul.mubr.msk.f32.gmra.mrb[30].mxu0 %vm437_vm0, %v3449_v38 }
 0x797   : > { %2729 = vmatprep.mubr.msk.f32.mxu0 %vm437_vm0, %v3454_v39 }
 0x79a   : > { %2730 = vmatmul.mubr.msk.f32.gmra.mrb[32].mxu0 %vm437_vm0, %v3463_v40 }
 0x79b   : > { %2732 = vmatprep.mubr.msk.f32.mxu0 %vm437_vm0, %v3468_v41 }
 0x79e   : > { %2733 = vmatmul.mubr.msk.f32.gmra.mrb[34].mxu0 %vm437_vm0, %v3477_v42 }
 0x79f   : > { %2735 = vmatprep.mubr.msk.f32.mxu0 %vm437_vm0, %v3484_v43 }
 0x7a2   : > { %2736 = vmatmul.mubr.msk.f32.gmra.mrb[36].mxu0 %vm437_vm0, %v3491_v44 }
 0x7a3   : > { %2738 = vmatprep.mubr.msk.f32.mxu0 %vm437_vm0, %v3498_v45 }
 0x7a6   : > { %2739 = vmatmul.mubr.msk.f32.gmra.mrb[38].mxu0 %vm437_vm0, %v3505_v46 }
 0x7a7   : > { %2741 = vmatprep.mubr.msk.f32.mxu0 %vm437_vm0, %v3512_v47 }
 0x7aa   : > { %2742 = vmatmul.mubr.msk.f32.gmra.mrb[40].mxu0 %vm437_vm0, %v3519_v48 }
 0x7ab   : > { %2744 = vmatprep.mubr.msk.f32.mxu0 %vm437_vm0, %v3524_v49 }
 0x7ae   : > { %2745 = vmatmul.mubr.msk.f32.gmra.mrb[42].mxu0 %vm437_vm0, %v3533_v50 }
 0x7af   : > { %2751 = vmatprep.mubr.msk.f32.mxu0 %vm437_vm0, %v1407_v13 }
 0x7b2   : > { %2752 = vmatmul.mubr.msk.f32.vlgmr.msra.gmra.mrb[44].mxu0 %vm437_vm0, %v2673_v29  ;;  %vm2148_vm0 = vcmask 261120  }
 0x7b3   : > { %2955 = vmatpush3.bf16.msra.mxu0 %v3672_v58 }
 0x7b4   : > { %2957 = vmatprep.subr.bf16.mxu0 %v3680_v2 }
 0x7b7   : > { %2959 = vmatpush3.bf16.msra.mxu0 %v3680_v2 }
 0x7b8   : > { %2961 = vmatprep.subr.bf16.mxu0 %v3696_v11 }
 0x7bb   : > { %2963 = vmatpush3.bf16.msra.mxu0 %v3696_v11 }
 0x7bc   : > { %2965 = vmatprep.subr.bf16.mxu0 %v3710_v20 }
 0x7bf   : > { %2967 = vmatpush3.bf16.msra.mxu0 %v3710_v20 }
 0x7c0   : > { %2969 = vmatprep.subr.bf16.mxu0 %v3720_v26 }
 0x7c3   : > { %2971 = vmatpush3.bf16.msra.mxu0 %v3720_v26 }
 0x7c4   : > { %2973 = vmatprep.subr.bf16.mxu0 %v3730_v33 }
 0x7c7   : > { %2975 = vmatpush3.bf16.msra.mxu0 %v3730_v33 }
 0x7c8   : > { %2977 = vmatprep.subr.bf16.mxu0 %v3740_v52 }
 0x7cb   : > { %2979 = vmatpush3.bf16.msra.mxu0 %v3740_v52 }
 0x7cc   : > { %2981 = vmatprep.subr.bf16.mxu0 %v3750_v6 }
 0x7cf   : > { %2983 = vmatpush3.bf16.msra.mxu0 %v3750_v6 }
 0x7d0   : > { %2985 = vmatprep.subr.bf16.mxu0 %v3922_v35 }
 0x858   : > { %v2718_v36 = vpop.f32.mrb[6].mxu1 }
 0x859   : > { %1653 = vrot.lane.b32.xlu0 %v2718_v36, %s3153_s8  ;;  %v1642_v37 = vpop.f32.mrb[7].mxu1 }
 0x85d   : > { %1651 = vrot.lane.b32.xlu0 %v1642_v37, %s3153_s8  ;;  %s3161_s8 = smov 16  }
 0x865   : > { %v2725_v38 = vpop.f32.mrb[28].mxu0 }
 0x866   : > { %v1817_v39 = vrot.slane %v2725_v38, 7  ;;  %v1747_v40 = vpop.f32.mrb[29].mxu0 }
 0x867   : > { %v1816_v41 = vrot.slane %v1747_v40, 7 }
 0x869   : > { %v1825_v42 = vsel %vm1019_vm4, %v1816_v41, %v1817_v39  ;;  %v2728_v43 = vpop.f32.mrb[30].mxu0 }
 0x86a   : > { %v3931_v44 = vsel %vm3580_vm5, %v1825_v42, %v2725_v38  ;;  %v1757_v45 = vpop.f32.mrb[31].mxu0 }
 0x86d   : > { %v2731_v46 = vpop.f32.mrb[32].mxu0 }
 0x86e   : > { %v1765_v47 = vpop.f32.mrb[33].mxu0 }
 0x871   : > { %v2734_v48 = vpop.f32.mrb[34].mxu0 }
 0x872   : > { %v1773_v49 = vpop.f32.mrb[35].mxu0 }
 0x875   : > { %v2737_v50 = vpop.f32.mrb[36].mxu0 }
 0x876   : > { %v1781_v58 = vpop.f32.mrb[37].mxu0 }
 0x879   : > { %v2740_v2 = vpop.f32.mrb[38].mxu0 }
 0x87a   : > { %v1789_v11 = vpop.f32.mrb[39].mxu0 }
 0x87d   : > { %v2743_v20 = vpop.f32.mrb[40].mxu0 }
 0x87e   : > { %v1819_v26 = vrot.slane %v2743_v20, 7  ;;  %v1797_v33 = vpop.f32.mrb[41].mxu0 }
 0x87f   : > { %v1818_v52 = vrot.slane %v1797_v33, 7 }
 0x881   : > { %v1824_v6 = vsel %vm1019_vm4, %v1818_v52, %v1819_v26  ;;  %v2746_v24 = vpop.f32.mrb[42].mxu0 }
 0x882   : > { %v1829_v54 = vsel %vm3580_vm5, %v1824_v6, %v2743_v20  ;;  %v1821_v30 = vrot.slane %v2746_v24, 7  ;;  %v1807_v19 = vpop.f32.mrb[43].mxu0 }
 0x883   : > { %v1820_v63 = vrot.slane %v1807_v19, 7  ;;  %v1834_v15 = vrot.slane %v1829_v54, 6 }
 0x884   : > { %v1826_v27 = vsel %vm1019_vm4, %v1821_v30, %v1816_v41 }
 0x885   : > { %v1827_v62 = vsel %vm3580_vm5, %v1826_v27, %v1747_v40  ;;  %v1822_v55 = vsel %vm1019_vm4, %v1820_v63, %v1821_v30  ;;  %v1823_v60 = vsel %vm1019_vm4, %v1819_v26, %v1820_v63  ;;  %v2753_v22 = vpop.f32.mrb[44].mxu0  ;;  %v1833_v26 = vrot.slane %v3931_v44, 6 }
 0x886   : > { %v1830_v28 = vsel %vm3580_vm5, %v1823_v60, %v1807_v19  ;;  %v1831_v34 = vsel %vm3580_vm5, %v1822_v55, %v2746_v24  ;;  %v1923_v16 = vpop.f32.mrb[45].mxu0  ;;  %v1832_v8 = vrot.slane %v1827_v62, 6 }
 0x887   : > { %v1835_v51 = vrot.slane %v1830_v28, 6  ;;  %v1836_v21 = vrot.slane %v1831_v34, 6 }
 0x888   : > { %v1839_v33 = vsel %vm1035_vm6, %v1832_v8, %v1833_v26 }
 0x889   : > { %v1837_v18 = vsel %vm1035_vm6, %v1835_v51, %v1836_v21  ;;  %v1838_v1 = vsel %vm1035_vm6, %v1834_v15, %v1835_v51  ;;  %v1840_v59 = vsel %vm1035_vm6, %v1836_v21, %v1832_v8  ;;  %v1842_v52 = vsel %vm3609_vm7, %v1839_v33, %v3931_v44 }
 0x88a   : > { %v1843_v5 = vsel %vm3609_vm7, %v1838_v1, %v1830_v28  ;;  %v1841_v4 = vsel %vm3609_vm7, %v1840_v59, %v1827_v62  ;;  %v1844_v9 = vsel %vm3609_vm7, %v1837_v18, %v1831_v34  ;;  %v1846_v6 = vrot.slane %v1842_v52, 4 }
 0x88b   : > { %v1847_v17 = vrot.slane %v1843_v5, 4  ;;  %v1848_v38 = vrot.slane %v1844_v9, 4 }
 0x88d   : > { %v1849_v39 = vsel %vm1048_vm8, %v1847_v17, %v1848_v38 }
 0x88e   : > { %v1854_v41 = vsel %vm3636_vm9, %v1849_v39, %v1844_v9 }
 0x8cb   : > { %v1654_v61 = vpop.permute.xlu0 %1653 }
 0x8cc   : > { %v1656_v29 = vsel %vm3555_vm2, %v1654_v61, %v2718_v36  ;;  %v1845_v36 = vrot.slane %v1841_v4, 4 }
 0x8cd   : > { %1659 = vrot.lane.b32.xlu1 %v1656_v29, %s3154_s10 }
 0x8ce   : > { %v1850_v24 = vsel %vm1048_vm8, %v1845_v36, %v1846_v6 }
 0x8cf   : > { %v1652_v25 = vpop.permute.xlu0 %1651  ;;  %v1853_v54 = vsel %vm3636_vm9, %v1850_v24, %v1842_v52 }
 0x8d0   : > { %v1655_v13 = vsel %vm3566_vm3, %v1652_v25, %v1642_v37  ;;  %v1851_v37 = vsel %vm1048_vm8, %v1848_v38, %v1845_v36 }
 0x8d1   : > { %1657 = vrot.lane.b32.xlu0 %v1655_v13, %s3154_s10  ;;  %v1852_v40 = vsel %vm3636_vm9, %v1851_v37, %v1841_v4  ;;  %s331_s10 = sand.u32 1, %s3135_s25  }
 0x8d2   : > { %v1855_v58 = vsel %vm3770_vm14, %v1854_v41, %v1852_v40  ;;  %v1856_v63 = vsel %vm3770_vm14, %v1852_v40, %v1853_v54 }
 0x93f   : > { %v1660_v42 = vpop.permute.xlu1 %1659 }
 0x940   : > { %v1662_v43 = vsel %vm3658_vm10, %v1660_v42, %v1656_v29 }
 0x941   : > { %1665 = vrot.lane.b32.xlu1 %v1662_v43, %s3155_s15 }
 0x943   : > { %v1658_v45 = vpop.permute.xlu0 %1657 }
 0x944   : > { %v1661_v46 = vsel %vm3689_vm11, %v1658_v45, %v1655_v13 }
 0x945   : > { %1663 = vrot.lane.b32.xlu0 %v1661_v46, %s3155_s15  ;;  %s2291_s15 = sshll.u32 %s331_s10, 4 }
 0x9b3   : > { %v1666_v47 = vpop.permute.xlu1 %1665 }
 0x9b4   : > { %v1668_v48 = vsel %vm3757_vm12, %v1666_v47, %v1662_v43 }
 0x9b5   : > { %1671 = vrot.lane.b32.xlu1 %v1668_v48, %s3156_s16 }
 0x9b7   : > { %v1664_v49 = vpop.permute.xlu0 %1663 }
 0x9b8   : > { %v1667_v50 = vsel %vm3766_vm13, %v1664_v49, %v1661_v46 }
 0x9b9   : > { %v1924_v2 = vadd.f32 %v1923_v16, %v1667_v50 }
 0x9bb   : > { %v1932_v11 = vadd.f32 %v1924_v2, %v1855_v58 }
 0x9bd   : > { %v1934_v20 = vsel %vm1134_vm15, %v1932_v11, -inf }
 0x9be   : > { %1935 = vmax.xlane.f32.xlu0 %v1934_v20 }
 0xa27   : > { %v1672_v30 = vpop.permute.xlu1 %1671 }
 0xa28   : > { %v1929_v19 = vadd.f32 %v2753_v22, %v1672_v30 }
 0xa2a   : > { %v1933_v27 = vadd.f32 %v1929_v19, %v1856_v63 }
 0xa2c   : > { %v1937_v15 = vsel %vm1134_vm15, %v1933_v27, -inf }
 0xa2d   : > { %1938 = vmax.xlane.f32.xlu1 %v1937_v15 }
 0xa4b   : > { %v1936_v62 = vpop.xlane.xlu0 %1935 }
 0xa4c   : > { %v1940_v55 = vsub.f32 %v1932_v11, %v1936_v62 }
 0xa4e   : > { %v1942_v3 = vmul.f32 1.442695, %v1940_v55 }
 0xa50   : > { %3065 = vpow2.f32 %v1942_v3 }
 0xa5a   : > { %v3066_v44 = vpop.eup %3065 }
 0xa5b   : > { %v1946_v56 = vsel %vm1134_vm15, %v3066_v44, 0.0 }
 0xa5c   : > { %1947 = vadd.xlane.f32.xlu1 %v1946_v56 }
 0xaba   : > { %v1939_v60 = vpop.xlane.xlu1 %1938 }
 0xabb   : > { %v1941_v23 = vsub.f32 %v1933_v27, %v1939_v60 }
 0xabd   : > { %v1944_v28 = vmul.f32 1.442695, %v1941_v23 }
 0xabf   : > { %3067 = vpow2.f32 %v1944_v28 }
 0xac9   : > { %v3068_v22 = vpop.eup %3067 }
 0xaca   : > { %v1949_v57 = vsel %vm1134_vm15, %v3068_v22, 0.0 }
 0xacb   : > { %1950 = vadd.xlane.f32.xlu0 %v1949_v57 }
 0xae9   : > { %v1948_v34 = vpop.xlane.xlu1 %1947 }
 0xaea   : > { %3069 = vrcp.f32 %v1948_v34 }
 0xaf4   : > { %v3070_v16 = vpop.eup %3069 }
 0xaf5   : > { %v1954_v51 = vmul.f32 %v3070_v16, %v3066_v44 }
 0xaf7   : > { %v1956_v21 = vsel %vm1134_vm15, %v1954_v51, 0.0 }
 0xaf8   : > { %1958 = vrot.lane.b32.xlu1 %v1956_v21, %s3157_s17 }
 0xb58   : > { %v1951_v18 = vpop.xlane.xlu0 %1950 }
 0xb59   : > { %3071 = vrcp.f32 %v1951_v18 }
 0xb63   : > { %v3072_v1 = vpop.eup %3071 }
 0xb64   : > { %v1955_v5 = vmul.f32 %v3072_v1, %v3068_v22 }
 0xb66   : > { %v1957_v61 = vsel %vm1134_vm15, %v1955_v5, 0.0 }
 0xb67   : > { %1960 = vrot.lane.b32.xlu0 %v1957_v61, %s3157_s17  ;;  %s333_s17 = scalar_lea.vmem [#allocation2], %s2291_s15 }
 0xb6a   : > { %v1959_v29 = vpop.permute.xlu1 %1958 }
 0xb6b   : > { %v1962_v25 = vsel %vm3566_vm3, %v1959_v29, %v1956_v21 }
 0xb6c   : > { %1964 = vrot.lane.b32.xlu0 %v1962_v25, %s3158_s18 }
 0xbd9   : > { %v1961_v13 = vpop.permute.xlu0 %1960 }
 0xbda   : > { %v1963_v8 = vsel %vm3555_vm2, %v1961_v13, %v1957_v61 }
 0xbdb   : > { %1966 = vrot.lane.b32.xlu1 %v1963_v8, %s3158_s18  ;;  %s2166_s18 = sshll.u32 %s333_s17, 4  ;;  %s4030_s18 = int_to_ptr.vmem [resolvable:$true] %s2166_s18 }
 0xbdc   : > { %s3073_s30 = scalar_lea.vmem %s4030_s18, 256  ;;  %p3080_p1 = scmp.lt.s32.totalorder %s4030_s18, %s3078_s21 }
 0xbdd   : > { %p3074_p12 = scmp.ne.s32.totalorder %s4030_s18, %s3073_s30 }
 0xbde   : > { %v1965_v17 = vpop.permute.xlu0 %1964 }
 0xbdf   : > { %v1968_v59 = vsel %vm3689_vm11, %v1965_v17, %v1962_v25  ;;  %p3075_p13 = pnand %p3074_p12, %p3244_p4 }
 0xbe0   : > { %1970 = vrot.lane.b32.xlu0 %v1968_v59, %s3159_s19 }
 0xbe1   : > { %p3076_p0 = pneg %p3075_p13 }
 0xc4d   : > { %v1967_v4 = vpop.permute.xlu1 %1966 }
 0xc4e   : > { %v1969_v9 = vsel %vm3658_vm10, %v1967_v4, %v1963_v8 }
 0xc4f   : > { %1972 = vrot.lane.b32.xlu1 %v1969_v9, %s3159_s19  ;;  %s2399_s19 = sshll.u32 %s3143_s27, 8  ;;  %s4041_s27 = scalar_lea.sflag [#allocation3], %s331_s10 }
 0xc50   : > { %s4037_s23 = scalar_lea.hbm %s4095_s7, %s2399_s19 }
 0xc52   : > { %v1971_v12 = vpop.permute.xlu0 %1970 }
 0xc53   : > { %v1974_v0 = vsel %vm3766_vm13, %v1971_v12, %v1968_v59 }
 0xc54   : > { %2786 = vmatprep.mubr.f32.mxu0 %v1974_v0 }
 0xcc1   : > { %v1973_v36 = vpop.permute.xlu1 %1972 }
 0xcc2   : > { %v1975_v38 = vsel %vm3757_vm12, %v1973_v36, %v1969_v9 }
 0xcc3   : > { %1978 = vrot.lane.b32.xlu1 %v1975_v38, %s3160_s20 }
 0xd35   : > { %v1979_v10 = vpop.permute.xlu1 %1978 }
 0xd36   : > { %2787 = vmatmul.mubr.f32.vlgmr.msra.gmra.mrb[46].mxu0 %v1979_v10 }
 0xd37   : > { %2987 = vmatpush3.bf16.msra.mxu0 %v3922_v35  ;;  %2793 = vmatprep.mubr.msk.f32.mxu0 %vm1134_vm15, %v1954_v51 }
 0xd3e   : > { %2794 = vmatmul.mubr.msk.f32.vlgmr.msra.gmra.mrb[46].mxu0 %vm1134_vm15, %v1955_v5 }
 0xe11   : > { %v2795_v31 = vpop.f32.mrb[46].mxu0 }
 0xe12   : > { %2142 = vrot.lane.b32.xlu1 %v2795_v31, %s3161_s8  ;;  %v2129_v32 = vpop.f32.mrb[47].mxu0 }
 0xe13   : > { %2140 = vrot.lane.b32.xlu0 %v2129_v32, %s3161_s8  ;;  %s3079_s8 = scalar_lea.vmem %s3078_s21, 512 }
 0xe14   : > { %p3081_p2 = scmp.lt.s32.totalorder %s3079_s8, %s3073_s30 }
 0xe16   : > { %p3082_p3 = por %p3081_p2, %p3080_p1 }
 0xe18   : > { %p3083_p5 = pnand %p3082_p3, %p3076_p0 }
 0xe84   : > { %v2143_v14 = vpop.permute.xlu1 %2142 }
 0xe85   : > { %v2147_v35 = vsel %vm1134_vm15, %v3860_v53, %v2143_v14  ;;  %v2141_v39 = vpop.permute.xlu0 %2140 }
 0xe86   : > { %2150 = vst.msk [vmem:[%s333_s17 + $0x8] sm:$0xff] %vm2148_vm0, %v2147_v35  ;;  %v2146_v37 = vsel %vm1134_vm15, %v3862_v7, %v2141_v39 }
 0xe87   : > { %2149 = vst.msk [vmem:[%s333_s17] sm:$0xff] %vm2148_vm0, %v2146_v37 }
 0xe88   : > { %3086 = shalt.err (!%p3083_p5)
}
 0xe89   : > { %s3087_s10 = scalar_lea.hbm %s4037_s23, 256  ;;  %s3091_s19 = scalar_lea.hbm %s4095_s7, 512 }
 0xe8a   : > { %p3088_p6 = scmp.ne.s32.totalorder %s4037_s23, %s3087_s10  ;;  %p3092_p10 = scmp.lt.u32.totalorder %s4037_s23, %s4095_s7 }
 0xe8b   : > { %p3093_p11 = scmp.lt.u32.totalorder %s3091_s19, %s3087_s10  ;;  %p3095_p13 = scmp.lt.u32.totalorder %s3087_s10, %s4037_s23 }
 0xe8c   : > { %p3089_p7 = pnand %p3088_p6, %p3244_p4 }
 0xe8d   : > { %p3094_p12 = por %p3093_p11, %p3092_p10 }
 0xe8e   : > { %p3090_p9 = pneg %p3089_p7 }
 0xe8f   : > { %p3096_p0 = por %p3095_p13, %p3094_p12 }
 0xe91   : > { %p3097_p1 = pnand %p3096_p0, %p3090_p9 }
 0xe93   : > { %3100 = shalt.err (!%p3097_p1)
}
 0xe94   : > { %s3163_s30 = smov 128  }
 0xe95   : > { %2992 = dma.vmem_to_hbm [thread:$0]  (%p3244_p4), %s4030_s18, 256, %s4037_s23, %s4041_s27, %s3163_s30, %s3163_s30, %s3156_s16  }
 0xe96 PF: > { %p2998_p2 = scmp.ge.s32.totalorder %s3151_s29, 2  ;;  %s2181_s12 = sand.u32 1, %s3131_s24  }
 0xe97   : > { %s2182_s21 = scalar_lea.sflag [#allocation3], %s2181_s12 }
 0xe98   : > { %p2995_p3 = pnand %p2998_p2, %p3251_p8 }
 0xe9a   : > { %3126 = dma.done.wait (!%p2995_p3), %s2182_s21, 256  }
 0xe9b   : > { %3128 = vsyncadd (!%p2995_p3), %s2182_s21, 4294967040  ;;  %s20_s29 = sadd.s32 1, %s3151_s29   ;;  %s4120_s24 = smov %s3135_s25 }
 0xe9c   : > { %p17_p5 = scmp.ge.s32.totalorder %s20_s29, 4   ;;  %s4121_s25 = smov %s3139_s26 }
 0xe9d   : > { %s4122_s26 = smov %s3257_s14  ;;  %s4123_s27 = smov %s3147_s28 }
 0xe9e   : > { %s4124_s28 = smov %s4126_s9  ;;  %19 = sbr.rel (!%p17_p5) target bundleno = 4 (0x4), region = 95 }
 0xea5   :  { %2187 = vsyncpa [#allocation3], 1 }
 0xea6   :  { %2189 = vsyncpa [#allocation3 + $0x1], 1 }

</bundles_post_ra>
